<compile_context>
chip_gen: v7x
topology: tpu7x:2x2x1
jax: 0.10.0
libtpu: 0.0.40
codegen_flags: <defaults>
</compile_context>

<pallas_src>
import functools

import jax
import jax.numpy as jnp
from jax.experimental import pallas as pl
from jax.experimental.pallas import tpu as pltpu


def encoder_stack_kernel(
    x_ref,
    wqkv_ref, bqkv_ref, wo_ref, bo_ref,
    ln1_g_ref, ln1_b_ref,
    w1_ref, b1_ref, w2_ref, b2_ref,
    ln2_g_ref, ln2_b_ref,
    o_ref,
    *, num_layers: int, num_heads: int, batch: int, eps: float = 1e-5,
):
    y = x_ref[...].astype(jnp.float32)          # [B*S, D]
    BS, D = y.shape
    S = BS // batch
    Dh = D // num_heads
    scale = 1.0 / float(Dh) ** 0.5

    def mxu(a, b):
        # bf16 MXU inputs, f32 accumulation.
        return jnp.dot(a.astype(jnp.bfloat16), b.astype(jnp.bfloat16),
                       preferred_element_type=jnp.float32)

    for l in range(num_layers):                 # static: num_layers is small
        wqkv = wqkv_ref[l]                      # [D, 3D]  bf16
        bqkv = bqkv_ref[l]                      # [1, 3D]  f32
        wo = wo_ref[l]                          # [D, D]   bf16
        bo = bo_ref[l]                          # [1, D]   f32
        g1, be1 = ln1_g_ref[l], ln1_b_ref[l]    # [1, D]   f32
        w1 = w1_ref[l]                          # [D, d_ff] bf16
        fb1 = b1_ref[l]                         # [1, d_ff] f32
        w2 = w2_ref[l]                          # [d_ff, D] bf16
        fb2 = b2_ref[l]                         # [1, D]   f32
        g2, be2 = ln2_g_ref[l], ln2_b_ref[l]    # [1, D]   f32

        # ---- fused QKV projection over all B*S rows ----------------------
        qkv = mxu(y, wqkv) + bqkv               # [BS, 3D] f32
        q = qkv[:, 0:D]
        k = qkv[:, D:2 * D]
        v = qkv[:, 2 * D:3 * D]

        # ---- multi-head self-attention (per batch element) ---------------
        rows = []
        for bi in range(batch):                 # static loops: batch/heads small
            r0 = bi * S
            qb = q[r0:r0 + S, :]
            kb = k[r0:r0 + S, :]
            vb = v[r0:r0 + S, :]
            acc = jnp.zeros((S, D), jnp.float32)
            for h in range(num_heads):
                c0 = h * Dh
                qh = qb[:, c0:c0 + Dh]          # [S, Dh]
                kh = kb[:, c0:c0 + Dh]          # [S, Dh]
                vh = vb[:, c0:c0 + Dh]          # [S, Dh]
                sc = jnp.dot(qh, kh.T,
                             preferred_element_type=jnp.float32) * scale
                sc = sc - jnp.max(sc, axis=-1, keepdims=True)
                p = jnp.exp(sc)
                p = p * pl.reciprocal(jnp.sum(p, axis=-1, keepdims=True),
                                      approx=True)
                hv = jnp.dot(p, vh, preferred_element_type=jnp.float32)  # [S, Dh]
                # accumulate output projection per head (no lane concat)
                acc = acc + mxu(hv, wo[c0:c0 + Dh, :])
            rows.append(acc)
        attn = jnp.concatenate(rows, axis=0) + bo            # [BS, D]

        # ---- residual + LayerNorm 1 ---------------------------------------
        h1 = y + attn
        mu1 = jnp.mean(h1, axis=-1, keepdims=True)
        var1 = jnp.mean(jnp.square(h1 - mu1), axis=-1, keepdims=True)
        y1 = (h1 - mu1) * jax.lax.rsqrt(var1 + eps) * g1 + be1

        # ---- position-wise feed-forward ------------------------------------
        f = jnp.maximum(mxu(y1, w1) + fb1, 0.0)               # [BS, d_ff]
        f = mxu(f, w2) + fb2                                   # [BS, D]

        # ---- residual + LayerNorm 2 ---------------------------------------
        h2 = y1 + f
        mu2 = jnp.mean(h2, axis=-1, keepdims=True)
        var2 = jnp.mean(jnp.square(h2 - mu2), axis=-1, keepdims=True)
        y = (h2 - mu2) * jax.lax.rsqrt(var2 + eps) * g2 + be2

    o_ref[...] = y.astype(o_ref.dtype)


def encoder_forward(x, params, num_heads):
    """x: [B, S, D]; params: dict of arrays stacked on a leading layer axis."""
    B, S, D = x.shape
    num_layers = params["wqkv"].shape[0]

    kernel = functools.partial(
        encoder_stack_kernel,
        num_layers=num_layers, num_heads=num_heads, batch=B)

    vmem_spec = pl.BlockSpec(memory_space=pltpu.MemorySpace.VMEM)
    args = (
        x.reshape(B * S, D),
        params["wqkv"], params["bqkv"], params["wo"], params["bo"],
        params["ln1_g"], params["ln1_b"],
        params["w1"], params["b1"], params["w2"], params["b2"],
        params["ln2_g"], params["ln2_b"],
    )

    y = pl.pallas_call(
        kernel,
        out_shape=jax.ShapeDtypeStruct((B * S, D), x.dtype),
        in_specs=[vmem_spec] * len(args),
        out_specs=vmem_spec,
    )(*args)
    return y.reshape(B, S, D)


def init_params(key, num_layers, d_model, d_ff):
    """Per-layer Linear/LayerNorm params, stacked on a leading layer axis.

    Matmul weights are stored bf16 (MXU inputs); biases / LN params stay f32.
    """
    def one_layer(k):
        ks = jax.random.split(k, 6)
        s = 0.02
        wq = s * jax.random.normal(ks[0], (d_model, d_model), jnp.float32)
        wk = s * jax.random.normal(ks[1], (d_model, d_model), jnp.float32)
        wv = s * jax.random.normal(ks[2], (d_model, d_model), jnp.float32)
        wo = s * jax.random.normal(ks[3], (d_model, d_model), jnp.float32)
        w1 = s * jax.random.normal(ks[4], (d_model, d_ff), jnp.float32)
        w2 = s * jax.random.normal(ks[5], (d_ff, d_model), jnp.float32)
        return {
            "wqkv": jnp.concatenate([wq, wk, wv], axis=1).astype(jnp.bfloat16),
            "bqkv": jnp.zeros((1, 3 * d_model), jnp.float32),
            "wo": wo.astype(jnp.bfloat16),
            "bo": jnp.zeros((1, d_model), jnp.float32),
            "ln1_g": jnp.ones((1, d_model), jnp.float32),
            "ln1_b": jnp.zeros((1, d_model), jnp.float32),
            "w1": w1.astype(jnp.bfloat16),
            "b1": jnp.zeros((1, d_ff), jnp.float32),
            "w2": w2.astype(jnp.bfloat16),
            "b2": jnp.zeros((1, d_ff * 0 + d_model), jnp.float32),
            "ln2_g": jnp.ones((1, d_model), jnp.float32),
            "ln2_b": jnp.zeros((1, d_model), jnp.float32),
        }

    layer_keys = jax.random.split(key, num_layers)
    layers = [one_layer(k) for k in layer_keys]
    return {name: jnp.stack([lyr[name] for lyr in layers], axis=0)
            for name in layers[0]}


if __name__ == "__main__":
    # Shapes consistent with the module: d_model=32, heads=4, d_ff=64,
    # dropout=0.1 (inference -> identity), num_encoders=2; input [B=2, S=8, D=32].
    d_model, num_heads, d_ff, num_encoders = 32, 4, 64, 2
    B, S = 2, 8
    assert d_model % num_heads == 0, "d_model must be divisible by num_heads"

    root = jax.random.PRNGKey(0)
    x_key, p_key = jax.random.split(root)
    x = jax.random.normal(x_key, (B, S, d_model), jnp.float32)
    params = init_params(p_key, num_encoders, d_model, d_ff)

    y = encoder_forward(x, params, num_heads)
    jax.block_until_ready(y)
    assert y.shape == (B, S, d_model) and y.dtype == jnp.float32
    assert bool(jnp.all(jnp.isfinite(y)))
    print("KERNEL_OK")
</pallas_src>

<mosaic_0001>
module attributes {stable_mosaic.version = 11 : i64} {
  func.func @encoder_stack_kernel(%arg0: memref<16x32xf32, #tpu.memory_space<vmem>>, %arg1: memref<2x32x96xbf16, #tpu.memory_space<vmem>>, %arg2: memref<2x1x96xf32, #tpu.memory_space<vmem>>, %arg3: memref<2x32x32xbf16, #tpu.memory_space<vmem>>, %arg4: memref<2x1x32xf32, #tpu.memory_space<vmem>>, %arg5: memref<2x1x32xf32, #tpu.memory_space<vmem>>, %arg6: memref<2x1x32xf32, #tpu.memory_space<vmem>>, %arg7: memref<2x32x64xbf16, #tpu.memory_space<vmem>>, %arg8: memref<2x1x64xf32, #tpu.memory_space<vmem>>, %arg9: memref<2x64x32xbf16, #tpu.memory_space<vmem>>, %arg10: memref<2x1x32xf32, #tpu.memory_space<vmem>>, %arg11: memref<2x1x32xf32, #tpu.memory_space<vmem>>, %arg12: memref<2x1x32xf32, #tpu.memory_space<vmem>>, %arg13: memref<16x32xf32, #tpu.memory_space<vmem>>) attributes {dimension_semantics = [], scalar_prefetch = 0 : i64, scratch_operands = 0 : i64, tpu.core_type = #tpu.core_type<tc>} {
    %c0 = arith.constant 0 : index
    %c0_0 = arith.constant 0 : index
    %0 = vector.load %arg0[%c0, %c0_0] : memref<16x32xf32, #tpu.memory_space<vmem>>, vector<16x32xf32>
    %c0_1 = arith.constant 0 : index
    %c0_2 = arith.constant 0 : index
    %c0_3 = arith.constant 0 : index
    %1 = vector.load %arg1[%c0_1, %c0_2, %c0_3] : memref<2x32x96xbf16, #tpu.memory_space<vmem>>, vector<1x32x96xbf16>
    %2 = vector.shape_cast %1 : vector<1x32x96xbf16> to vector<32x96xbf16>
    %c0_4 = arith.constant 0 : index
    %c0_5 = arith.constant 0 : index
    %c0_6 = arith.constant 0 : index
    %3 = vector.load %arg2[%c0_4, %c0_5, %c0_6] : memref<2x1x96xf32, #tpu.memory_space<vmem>>, vector<1x1x96xf32>
    %4 = vector.shape_cast %3 : vector<1x1x96xf32> to vector<1x96xf32>
    %c0_7 = arith.constant 0 : index
    %c0_8 = arith.constant 0 : index
    %c0_9 = arith.constant 0 : index
    %5 = vector.load %arg3[%c0_7, %c0_8, %c0_9] : memref<2x32x32xbf16, #tpu.memory_space<vmem>>, vector<1x32x32xbf16>
    %6 = vector.shape_cast %5 : vector<1x32x32xbf16> to vector<32x32xbf16>
    %c0_10 = arith.constant 0 : index
    %c0_11 = arith.constant 0 : index
    %c0_12 = arith.constant 0 : index
    %7 = vector.load %arg4[%c0_10, %c0_11, %c0_12] : memref<2x1x32xf32, #tpu.memory_space<vmem>>, vector<1x1x32xf32>
    %8 = vector.shape_cast %7 : vector<1x1x32xf32> to vector<1x32xf32>
    %c0_13 = arith.constant 0 : index
    %c0_14 = arith.constant 0 : index
    %c0_15 = arith.constant 0 : index
    %9 = vector.load %arg5[%c0_13, %c0_14, %c0_15] : memref<2x1x32xf32, #tpu.memory_space<vmem>>, vector<1x1x32xf32>
    %10 = vector.shape_cast %9 : vector<1x1x32xf32> to vector<1x32xf32>
    %c0_16 = arith.constant 0 : index
    %c0_17 = arith.constant 0 : index
    %c0_18 = arith.constant 0 : index
    %11 = vector.load %arg6[%c0_16, %c0_17, %c0_18] : memref<2x1x32xf32, #tpu.memory_space<vmem>>, vector<1x1x32xf32>
    %12 = vector.shape_cast %11 : vector<1x1x32xf32> to vector<1x32xf32>
    %c0_19 = arith.constant 0 : index
    %c0_20 = arith.constant 0 : index
    %c0_21 = arith.constant 0 : index
    %13 = vector.load %arg7[%c0_19, %c0_20, %c0_21] : memref<2x32x64xbf16, #tpu.memory_space<vmem>>, vector<1x32x64xbf16>
    %14 = vector.shape_cast %13 : vector<1x32x64xbf16> to vector<32x64xbf16>
    %c0_22 = arith.constant 0 : index
    %c0_23 = arith.constant 0 : index
    %c0_24 = arith.constant 0 : index
    %15 = vector.load %arg8[%c0_22, %c0_23, %c0_24] : memref<2x1x64xf32, #tpu.memory_space<vmem>>, vector<1x1x64xf32>
    %16 = vector.shape_cast %15 : vector<1x1x64xf32> to vector<1x64xf32>
    %c0_25 = arith.constant 0 : index
    %c0_26 = arith.constant 0 : index
    %c0_27 = arith.constant 0 : index
    %17 = vector.load %arg9[%c0_25, %c0_26, %c0_27] : memref<2x64x32xbf16, #tpu.memory_space<vmem>>, vector<1x64x32xbf16>
    %18 = vector.shape_cast %17 : vector<1x64x32xbf16> to vector<64x32xbf16>
    %c0_28 = arith.constant 0 : index
    %c0_29 = arith.constant 0 : index
    %c0_30 = arith.constant 0 : index
    %19 = vector.load %arg10[%c0_28, %c0_29, %c0_30] : memref<2x1x32xf32, #tpu.memory_space<vmem>>, vector<1x1x32xf32>
    %20 = vector.shape_cast %19 : vector<1x1x32xf32> to vector<1x32xf32>
    %c0_31 = arith.constant 0 : index
    %c0_32 = arith.constant 0 : index
    %c0_33 = arith.constant 0 : index
    %21 = vector.load %arg11[%c0_31, %c0_32, %c0_33] : memref<2x1x32xf32, #tpu.memory_space<vmem>>, vector<1x1x32xf32>
    %22 = vector.shape_cast %21 : vector<1x1x32xf32> to vector<1x32xf32>
    %c0_34 = arith.constant 0 : index
    %c0_35 = arith.constant 0 : index
    %c0_36 = arith.constant 0 : index
    %23 = vector.load %arg12[%c0_34, %c0_35, %c0_36] : memref<2x1x32xf32, #tpu.memory_space<vmem>>, vector<1x1x32xf32>
    %24 = vector.shape_cast %23 : vector<1x1x32xf32> to vector<1x32xf32>
    %25 = arith.truncf %0 : vector<16x32xf32> to vector<16x32xbf16>
    %cst = arith.constant dense<0.000000e+00> : vector<16x96xf32>
    %26 = tpu.matmul %25, %2, %cst {dimension_numbers = #tpu.dot_dimension_numbers<[1], [0], [0], [1], [0, 0, 1, 1], [], []>} : vector<16x32xbf16>, vector<32x96xbf16>, vector<16x96xf32> -> vector<16x96xf32>
    %27 = vector.broadcast %4 : vector<1x96xf32> to vector<16x96xf32>
    %28 = arith.addf %26, %27 : vector<16x96xf32>
    %29 = vector.extract_strided_slice %28 {offsets = [0, 0], sizes = [16, 32], strides = [1, 1]} : vector<16x96xf32> to vector<16x32xf32>
    %30 = vector.extract_strided_slice %28 {offsets = [0, 32], sizes = [16, 32], strides = [1, 1]} : vector<16x96xf32> to vector<16x32xf32>
    %31 = vector.extract_strided_slice %28 {offsets = [0, 64], sizes = [16, 32], strides = [1, 1]} : vector<16x96xf32> to vector<16x32xf32>
    %32 = vector.extract_strided_slice %29 {offsets = [0, 0], sizes = [8, 32], strides = [1, 1]} : vector<16x32xf32> to vector<8x32xf32>
    %33 = vector.extract_strided_slice %30 {offsets = [0, 0], sizes = [8, 32], strides = [1, 1]} : vector<16x32xf32> to vector<8x32xf32>
    %34 = vector.extract_strided_slice %31 {offsets = [0, 0], sizes = [8, 32], strides = [1, 1]} : vector<16x32xf32> to vector<8x32xf32>
    %cst_37 = arith.constant 0.000000e+00 : f32
    %35 = vector.broadcast %cst_37 : f32 to vector<8x32xf32>
    %36 = vector.extract_strided_slice %32 {offsets = [0, 0], sizes = [8, 8], strides = [1, 1]} : vector<8x32xf32> to vector<8x8xf32>
    %37 = vector.extract_strided_slice %33 {offsets = [0, 0], sizes = [8, 8], strides = [1, 1]} : vector<8x32xf32> to vector<8x8xf32>
    %38 = vector.extract_strided_slice %34 {offsets = [0, 0], sizes = [8, 8], strides = [1, 1]} : vector<8x32xf32> to vector<8x8xf32>
    %39 = tpu.transpose %37, [1, 0] : vector<8x8xf32> -> vector<8x8xf32>
    %cst_38 = arith.constant dense<0.000000e+00> : vector<8x8xf32>
    %40 = tpu.matmul %36, %39, %cst_38 {dimension_numbers = #tpu.dot_dimension_numbers<[1], [0], [0], [1], [0, 0, 1, 1], [], []>} : vector<8x8xf32>, vector<8x8xf32>, vector<8x8xf32> -> vector<8x8xf32>
    %cst_39 = arith.constant 0.353553385 : f32
    %41 = vector.broadcast %cst_39 : f32 to vector<8x8xf32>
    %42 = arith.mulf %40, %41 : vector<8x8xf32>
    %cst_40 = arith.constant dense<0xFF800000> : vector<8xf32>
    %43 = vector.multi_reduction <maximumf>, %42, %cst_40 [1] : vector<8x8xf32> to vector<8xf32>
    %44 = vector.shape_cast %43 : vector<8xf32> to vector<8x1xf32>
    %45 = vector.broadcast %44 : vector<8x1xf32> to vector<8x8xf32>
    %46 = arith.subf %42, %45 : vector<8x8xf32>
    %47 = math.exp %46 : vector<8x8xf32>
    %cst_41 = arith.constant dense<0.000000e+00> : vector<8xf32>
    %48 = vector.multi_reduction <add>, %47, %cst_41 [1] : vector<8x8xf32> to vector<8xf32>
    %49 = vector.shape_cast %48 : vector<8xf32> to vector<8x1xf32>
    %50 = tpu.reciprocal %49 {approx = true} : vector<8x1xf32> -> vector<8x1xf32>
    %51 = vector.broadcast %50 : vector<8x1xf32> to vector<8x8xf32>
    %52 = arith.mulf %47, %51 : vector<8x8xf32>
    %cst_42 = arith.constant dense<0.000000e+00> : vector<8x8xf32>
    %53 = tpu.matmul %52, %38, %cst_42 {dimension_numbers = #tpu.dot_dimension_numbers<[1], [0], [0], [1], [0, 0, 1, 1], [], []>} : vector<8x8xf32>, vector<8x8xf32>, vector<8x8xf32> -> vector<8x8xf32>
    %54 = vector.extract_strided_slice %6 {offsets = [0, 0], sizes = [8, 32], strides = [1, 1]} : vector<32x32xbf16> to vector<8x32xbf16>
    %55 = arith.truncf %53 : vector<8x8xf32> to vector<8x8xbf16>
    %cst_43 = arith.constant dense<0.000000e+00> : vector<8x32xf32>
    %56 = tpu.matmul %55, %54, %cst_43 {dimension_numbers = #tpu.dot_dimension_numbers<[1], [0], [0], [1], [0, 0, 1, 1], [], []>} : vector<8x8xbf16>, vector<8x32xbf16>, vector<8x32xf32> -> vector<8x32xf32>
    %57 = arith.addf %35, %56 : vector<8x32xf32>
    %58 = vector.extract_strided_slice %32 {offsets = [0, 8], sizes = [8, 8], strides = [1, 1]} : vector<8x32xf32> to vector<8x8xf32>
    %59 = vector.extract_strided_slice %33 {offsets = [0, 8], sizes = [8, 8], strides = [1, 1]} : vector<8x32xf32> to vector<8x8xf32>
    %60 = vector.extract_strided_slice %34 {offsets = [0, 8], sizes = [8, 8], strides = [1, 1]} : vector<8x32xf32> to vector<8x8xf32>
    %61 = tpu.transpose %59, [1, 0] : vector<8x8xf32> -> vector<8x8xf32>
    %cst_44 = arith.constant dense<0.000000e+00> : vector<8x8xf32>
    %62 = tpu.matmul %58, %61, %cst_44 {dimension_numbers = #tpu.dot_dimension_numbers<[1], [0], [0], [1], [0, 0, 1, 1], [], []>} : vector<8x8xf32>, vector<8x8xf32>, vector<8x8xf32> -> vector<8x8xf32>
    %cst_45 = arith.constant 0.353553385 : f32
    %63 = vector.broadcast %cst_45 : f32 to vector<8x8xf32>
    %64 = arith.mulf %62, %63 : vector<8x8xf32>
    %cst_46 = arith.constant dense<0xFF800000> : vector<8xf32>
    %65 = vector.multi_reduction <maximumf>, %64, %cst_46 [1] : vector<8x8xf32> to vector<8xf32>
    %66 = vector.shape_cast %65 : vector<8xf32> to vector<8x1xf32>
    %67 = vector.broadcast %66 : vector<8x1xf32> to vector<8x8xf32>
    %68 = arith.subf %64, %67 : vector<8x8xf32>
    %69 = math.exp %68 : vector<8x8xf32>
    %cst_47 = arith.constant dense<0.000000e+00> : vector<8xf32>
    %70 = vector.multi_reduction <add>, %69, %cst_47 [1] : vector<8x8xf32> to vector<8xf32>
    %71 = vector.shape_cast %70 : vector<8xf32> to vector<8x1xf32>
    %72 = tpu.reciprocal %71 {approx = true} : vector<8x1xf32> -> vector<8x1xf32>
    %73 = vector.broadcast %72 : vector<8x1xf32> to vector<8x8xf32>
    %74 = arith.mulf %69, %73 : vector<8x8xf32>
    %cst_48 = arith.constant dense<0.000000e+00> : vector<8x8xf32>
    %75 = tpu.matmul %74, %60, %cst_48 {dimension_numbers = #tpu.dot_dimension_numbers<[1], [0], [0], [1], [0, 0, 1, 1], [], []>} : vector<8x8xf32>, vector<8x8xf32>, vector<8x8xf32> -> vector<8x8xf32>
    %76 = vector.extract_strided_slice %6 {offsets = [8, 0], sizes = [8, 32], strides = [1, 1]} : vector<32x32xbf16> to vector<8x32xbf16>
    %77 = arith.truncf %75 : vector<8x8xf32> to vector<8x8xbf16>
    %cst_49 = arith.constant dense<0.000000e+00> : vector<8x32xf32>
    %78 = tpu.matmul %77, %76, %cst_49 {dimension_numbers = #tpu.dot_dimension_numbers<[1], [0], [0], [1], [0, 0, 1, 1], [], []>} : vector<8x8xbf16>, vector<8x32xbf16>, vector<8x32xf32> -> vector<8x32xf32>
    %79 = arith.addf %57, %78 : vector<8x32xf32>
    %80 = vector.extract_strided_slice %32 {offsets = [0, 16], sizes = [8, 8], strides = [1, 1]} : vector<8x32xf32> to vector<8x8xf32>
    %81 = vector.extract_strided_slice %33 {offsets = [0, 16], sizes = [8, 8], strides = [1, 1]} : vector<8x32xf32> to vector<8x8xf32>
    %82 = vector.extract_strided_slice %34 {offsets = [0, 16], sizes = [8, 8], strides = [1, 1]} : vector<8x32xf32> to vector<8x8xf32>
    %83 = tpu.transpose %81, [1, 0] : vector<8x8xf32> -> vector<8x8xf32>
    %cst_50 = arith.constant dense<0.000000e+00> : vector<8x8xf32>
    %84 = tpu.matmul %80, %83, %cst_50 {dimension_numbers = #tpu.dot_dimension_numbers<[1], [0], [0], [1], [0, 0, 1, 1], [], []>} : vector<8x8xf32>, vector<8x8xf32>, vector<8x8xf32> -> vector<8x8xf32>
    %cst_51 = arith.constant 0.353553385 : f32
    %85 = vector.broadcast %cst_51 : f32 to vector<8x8xf32>
    %86 = arith.mulf %84, %85 : vector<8x8xf32>
    %cst_52 = arith.constant dense<0xFF800000> : vector<8xf32>
    %87 = vector.multi_reduction <maximumf>, %86, %cst_52 [1] : vector<8x8xf32> to vector<8xf32>
    %88 = vector.shape_cast %87 : vector<8xf32> to vector<8x1xf32>
    %89 = vector.broadcast %88 : vector<8x1xf32> to vector<8x8xf32>
    %90 = arith.subf %86, %89 : vector<8x8xf32>
    %91 = math.exp %90 : vector<8x8xf32>
    %cst_53 = arith.constant dense<0.000000e+00> : vector<8xf32>
    %92 = vector.multi_reduction <add>, %91, %cst_53 [1] : vector<8x8xf32> to vector<8xf32>
    %93 = vector.shape_cast %92 : vector<8xf32> to vector<8x1xf32>
    %94 = tpu.reciprocal %93 {approx = true} : vector<8x1xf32> -> vector<8x1xf32>
    %95 = vector.broadcast %94 : vector<8x1xf32> to vector<8x8xf32>
    %96 = arith.mulf %91, %95 : vector<8x8xf32>
    %cst_54 = arith.constant dense<0.000000e+00> : vector<8x8xf32>
    %97 = tpu.matmul %96, %82, %cst_54 {dimension_numbers = #tpu.dot_dimension_numbers<[1], [0], [0], [1], [0, 0, 1, 1], [], []>} : vector<8x8xf32>, vector<8x8xf32>, vector<8x8xf32> -> vector<8x8xf32>
    %98 = vector.extract_strided_slice %6 {offsets = [16, 0], sizes = [8, 32], strides = [1, 1]} : vector<32x32xbf16> to vector<8x32xbf16>
    %99 = arith.truncf %97 : vector<8x8xf32> to vector<8x8xbf16>
    %cst_55 = arith.constant dense<0.000000e+00> : vector<8x32xf32>
    %100 = tpu.matmul %99, %98, %cst_55 {dimension_numbers = #tpu.dot_dimension_numbers<[1], [0], [0], [1], [0, 0, 1, 1], [], []>} : vector<8x8xbf16>, vector<8x32xbf16>, vector<8x32xf32> -> vector<8x32xf32>
    %101 = arith.addf %79, %100 : vector<8x32xf32>
    %102 = vector.extract_strided_slice %32 {offsets = [0, 24], sizes = [8, 8], strides = [1, 1]} : vector<8x32xf32> to vector<8x8xf32>
    %103 = vector.extract_strided_slice %33 {offsets = [0, 24], sizes = [8, 8], strides = [1, 1]} : vector<8x32xf32> to vector<8x8xf32>
    %104 = vector.extract_strided_slice %34 {offsets = [0, 24], sizes = [8, 8], strides = [1, 1]} : vector<8x32xf32> to vector<8x8xf32>
    %105 = tpu.transpose %103, [1, 0] : vector<8x8xf32> -> vector<8x8xf32>
    %cst_56 = arith.constant dense<0.000000e+00> : vector<8x8xf32>
    %106 = tpu.matmul %102, %105, %cst_56 {dimension_numbers = #tpu.dot_dimension_numbers<[1], [0], [0], [1], [0, 0, 1, 1], [], []>} : vector<8x8xf32>, vector<8x8xf32>, vector<8x8xf32> -> vector<8x8xf32>
    %cst_57 = arith.constant 0.353553385 : f32
    %107 = vector.broadcast %cst_57 : f32 to vector<8x8xf32>
    %108 = arith.mulf %106, %107 : vector<8x8xf32>
    %cst_58 = arith.constant dense<0xFF800000> : vector<8xf32>
    %109 = vector.multi_reduction <maximumf>, %108, %cst_58 [1] : vector<8x8xf32> to vector<8xf32>
    %110 = vector.shape_cast %109 : vector<8xf32> to vector<8x1xf32>
    %111 = vector.broadcast %110 : vector<8x1xf32> to vector<8x8xf32>
    %112 = arith.subf %108, %111 : vector<8x8xf32>
    %113 = math.exp %112 : vector<8x8xf32>
    %cst_59 = arith.constant dense<0.000000e+00> : vector<8xf32>
    %114 = vector.multi_reduction <add>, %113, %cst_59 [1] : vector<8x8xf32> to vector<8xf32>
    %115 = vector.shape_cast %114 : vector<8xf32> to vector<8x1xf32>
    %116 = tpu.reciprocal %115 {approx = true} : vector<8x1xf32> -> vector<8x1xf32>
    %117 = vector.broadcast %116 : vector<8x1xf32> to vector<8x8xf32>
    %118 = arith.mulf %113, %117 : vector<8x8xf32>
    %cst_60 = arith.constant dense<0.000000e+00> : vector<8x8xf32>
    %119 = tpu.matmul %118, %104, %cst_60 {dimension_numbers = #tpu.dot_dimension_numbers<[1], [0], [0], [1], [0, 0, 1, 1], [], []>} : vector<8x8xf32>, vector<8x8xf32>, vector<8x8xf32> -> vector<8x8xf32>
    %120 = vector.extract_strided_slice %6 {offsets = [24, 0], sizes = [8, 32], strides = [1, 1]} : vector<32x32xbf16> to vector<8x32xbf16>
    %121 = arith.truncf %119 : vector<8x8xf32> to vector<8x8xbf16>
    %cst_61 = arith.constant dense<0.000000e+00> : vector<8x32xf32>
    %122 = tpu.matmul %121, %120, %cst_61 {dimension_numbers = #tpu.dot_dimension_numbers<[1], [0], [0], [1], [0, 0, 1, 1], [], []>} : vector<8x8xbf16>, vector<8x32xbf16>, vector<8x32xf32> -> vector<8x32xf32>
    %123 = arith.addf %101, %122 : vector<8x32xf32>
    %124 = vector.extract_strided_slice %29 {offsets = [8, 0], sizes = [8, 32], strides = [1, 1]} : vector<16x32xf32> to vector<8x32xf32>
    %125 = vector.extract_strided_slice %30 {offsets = [8, 0], sizes = [8, 32], strides = [1, 1]} : vector<16x32xf32> to vector<8x32xf32>
    %126 = vector.extract_strided_slice %31 {offsets = [8, 0], sizes = [8, 32], strides = [1, 1]} : vector<16x32xf32> to vector<8x32xf32>
    %cst_62 = arith.constant 0.000000e+00 : f32
    %127 = vector.broadcast %cst_62 : f32 to vector<8x32xf32>
    %128 = vector.extract_strided_slice %124 {offsets = [0, 0], sizes = [8, 8], strides = [1, 1]} : vector<8x32xf32> to vector<8x8xf32>
    %129 = vector.extract_strided_slice %125 {offsets = [0, 0], sizes = [8, 8], strides = [1, 1]} : vector<8x32xf32> to vector<8x8xf32>
    %130 = vector.extract_strided_slice %126 {offsets = [0, 0], sizes = [8, 8], strides = [1, 1]} : vector<8x32xf32> to vector<8x8xf32>
    %131 = tpu.transpose %129, [1, 0] : vector<8x8xf32> -> vector<8x8xf32>
    %cst_63 = arith.constant dense<0.000000e+00> : vector<8x8xf32>
    %132 = tpu.matmul %128, %131, %cst_63 {dimension_numbers = #tpu.dot_dimension_numbers<[1], [0], [0], [1], [0, 0, 1, 1], [], []>} : vector<8x8xf32>, vector<8x8xf32>, vector<8x8xf32> -> vector<8x8xf32>
    %cst_64 = arith.constant 0.353553385 : f32
    %133 = vector.broadcast %cst_64 : f32 to vector<8x8xf32>
    %134 = arith.mulf %132, %133 : vector<8x8xf32>
    %cst_65 = arith.constant dense<0xFF800000> : vector<8xf32>
    %135 = vector.multi_reduction <maximumf>, %134, %cst_65 [1] : vector<8x8xf32> to vector<8xf32>
    %136 = vector.shape_cast %135 : vector<8xf32> to vector<8x1xf32>
    %137 = vector.broadcast %136 : vector<8x1xf32> to vector<8x8xf32>
    %138 = arith.subf %134, %137 : vector<8x8xf32>
    %139 = math.exp %138 : vector<8x8xf32>
    %cst_66 = arith.constant dense<0.000000e+00> : vector<8xf32>
    %140 = vector.multi_reduction <add>, %139, %cst_66 [1] : vector<8x8xf32> to vector<8xf32>
    %141 = vector.shape_cast %140 : vector<8xf32> to vector<8x1xf32>
    %142 = tpu.reciprocal %141 {approx = true} : vector<8x1xf32> -> vector<8x1xf32>
    %143 = vector.broadcast %142 : vector<8x1xf32> to vector<8x8xf32>
    %144 = arith.mulf %139, %143 : vector<8x8xf32>
    %cst_67 = arith.constant dense<0.000000e+00> : vector<8x8xf32>
    %145 = tpu.matmul %144, %130, %cst_67 {dimension_numbers = #tpu.dot_dimension_numbers<[1], [0], [0], [1], [0, 0, 1, 1], [], []>} : vector<8x8xf32>, vector<8x8xf32>, vector<8x8xf32> -> vector<8x8xf32>
    %146 = vector.extract_strided_slice %6 {offsets = [0, 0], sizes = [8, 32], strides = [1, 1]} : vector<32x32xbf16> to vector<8x32xbf16>
    %147 = arith.truncf %145 : vector<8x8xf32> to vector<8x8xbf16>
    %cst_68 = arith.constant dense<0.000000e+00> : vector<8x32xf32>
    %148 = tpu.matmul %147, %146, %cst_68 {dimension_numbers = #tpu.dot_dimension_numbers<[1], [0], [0], [1], [0, 0, 1, 1], [], []>} : vector<8x8xbf16>, vector<8x32xbf16>, vector<8x32xf32> -> vector<8x32xf32>
    %149 = arith.addf %127, %148 : vector<8x32xf32>
    %150 = vector.extract_strided_slice %124 {offsets = [0, 8], sizes = [8, 8], strides = [1, 1]} : vector<8x32xf32> to vector<8x8xf32>
    %151 = vector.extract_strided_slice %125 {offsets = [0, 8], sizes = [8, 8], strides = [1, 1]} : vector<8x32xf32> to vector<8x8xf32>
    %152 = vector.extract_strided_slice %126 {offsets = [0, 8], sizes = [8, 8], strides = [1, 1]} : vector<8x32xf32> to vector<8x8xf32>
    %153 = tpu.transpose %151, [1, 0] : vector<8x8xf32> -> vector<8x8xf32>
    %cst_69 = arith.constant dense<0.000000e+00> : vector<8x8xf32>
    %154 = tpu.matmul %150, %153, %cst_69 {dimension_numbers = #tpu.dot_dimension_numbers<[1], [0], [0], [1], [0, 0, 1, 1], [], []>} : vector<8x8xf32>, vector<8x8xf32>, vector<8x8xf32> -> vector<8x8xf32>
    %cst_70 = arith.constant 0.353553385 : f32
    %155 = vector.broadcast %cst_70 : f32 to vector<8x8xf32>
    %156 = arith.mulf %154, %155 : vector<8x8xf32>
    %cst_71 = arith.constant dense<0xFF800000> : vector<8xf32>
    %157 = vector.multi_reduction <maximumf>, %156, %cst_71 [1] : vector<8x8xf32> to vector<8xf32>
    %158 = vector.shape_cast %157 : vector<8xf32> to vector<8x1xf32>
    %159 = vector.broadcast %158 : vector<8x1xf32> to vector<8x8xf32>
    %160 = arith.subf %156, %159 : vector<8x8xf32>
    %161 = math.exp %160 : vector<8x8xf32>
    %cst_72 = arith.constant dense<0.000000e+00> : vector<8xf32>
    %162 = vector.multi_reduction <add>, %161, %cst_72 [1] : vector<8x8xf32> to vector<8xf32>
    %163 = vector.shape_cast %162 : vector<8xf32> to vector<8x1xf32>
    %164 = tpu.reciprocal %163 {approx = true} : vector<8x1xf32> -> vector<8x1xf32>
    %165 = vector.broadcast %164 : vector<8x1xf32> to vector<8x8xf32>
    %166 = arith.mulf %161, %165 : vector<8x8xf32>
    %cst_73 = arith.constant dense<0.000000e+00> : vector<8x8xf32>
    %167 = tpu.matmul %166, %152, %cst_73 {dimension_numbers = #tpu.dot_dimension_numbers<[1], [0], [0], [1], [0, 0, 1, 1], [], []>} : vector<8x8xf32>, vector<8x8xf32>, vector<8x8xf32> -> vector<8x8xf32>
    %168 = vector.extract_strided_slice %6 {offsets = [8, 0], sizes = [8, 32], strides = [1, 1]} : vector<32x32xbf16> to vector<8x32xbf16>
    %169 = arith.truncf %167 : vector<8x8xf32> to vector<8x8xbf16>
    %cst_74 = arith.constant dense<0.000000e+00> : vector<8x32xf32>
    %170 = tpu.matmul %169, %168, %cst_74 {dimension_numbers = #tpu.dot_dimension_numbers<[1], [0], [0], [1], [0, 0, 1, 1], [], []>} : vector<8x8xbf16>, vector<8x32xbf16>, vector<8x32xf32> -> vector<8x32xf32>
    %171 = arith.addf %149, %170 : vector<8x32xf32>
    %172 = vector.extract_strided_slice %124 {offsets = [0, 16], sizes = [8, 8], strides = [1, 1]} : vector<8x32xf32> to vector<8x8xf32>
    %173 = vector.extract_strided_slice %125 {offsets = [0, 16], sizes = [8, 8], strides = [1, 1]} : vector<8x32xf32> to vector<8x8xf32>
    %174 = vector.extract_strided_slice %126 {offsets = [0, 16], sizes = [8, 8], strides = [1, 1]} : vector<8x32xf32> to vector<8x8xf32>
    %175 = tpu.transpose %173, [1, 0] : vector<8x8xf32> -> vector<8x8xf32>
    %cst_75 = arith.constant dense<0.000000e+00> : vector<8x8xf32>
    %176 = tpu.matmul %172, %175, %cst_75 {dimension_numbers = #tpu.dot_dimension_numbers<[1], [0], [0], [1], [0, 0, 1, 1], [], []>} : vector<8x8xf32>, vector<8x8xf32>, vector<8x8xf32> -> vector<8x8xf32>
    %cst_76 = arith.constant 0.353553385 : f32
    %177 = vector.broadcast %cst_76 : f32 to vector<8x8xf32>
    %178 = arith.mulf %176, %177 : vector<8x8xf32>
    %cst_77 = arith.constant dense<0xFF800000> : vector<8xf32>
    %179 = vector.multi_reduction <maximumf>, %178, %cst_77 [1] : vector<8x8xf32> to vector<8xf32>
    %180 = vector.shape_cast %179 : vector<8xf32> to vector<8x1xf32>
    %181 = vector.broadcast %180 : vector<8x1xf32> to vector<8x8xf32>
    %182 = arith.subf %178, %181 : vector<8x8xf32>
    %183 = math.exp %182 : vector<8x8xf32>
    %cst_78 = arith.constant dense<0.000000e+00> : vector<8xf32>
    %184 = vector.multi_reduction <add>, %183, %cst_78 [1] : vector<8x8xf32> to vector<8xf32>
    %185 = vector.shape_cast %184 : vector<8xf32> to vector<8x1xf32>
    %186 = tpu.reciprocal %185 {approx = true} : vector<8x1xf32> -> vector<8x1xf32>
    %187 = vector.broadcast %186 : vector<8x1xf32> to vector<8x8xf32>
    %188 = arith.mulf %183, %187 : vector<8x8xf32>
    %cst_79 = arith.constant dense<0.000000e+00> : vector<8x8xf32>
    %189 = tpu.matmul %188, %174, %cst_79 {dimension_numbers = #tpu.dot_dimension_numbers<[1], [0], [0], [1], [0, 0, 1, 1], [], []>} : vector<8x8xf32>, vector<8x8xf32>, vector<8x8xf32> -> vector<8x8xf32>
    %190 = vector.extract_strided_slice %6 {offsets = [16, 0], sizes = [8, 32], strides = [1, 1]} : vector<32x32xbf16> to vector<8x32xbf16>
    %191 = arith.truncf %189 : vector<8x8xf32> to vector<8x8xbf16>
    %cst_80 = arith.constant dense<0.000000e+00> : vector<8x32xf32>
    %192 = tpu.matmul %191, %190, %cst_80 {dimension_numbers = #tpu.dot_dimension_numbers<[1], [0], [0], [1], [0, 0, 1, 1], [], []>} : vector<8x8xbf16>, vector<8x32xbf16>, vector<8x32xf32> -> vector<8x32xf32>
    %193 = arith.addf %171, %192 : vector<8x32xf32>
    %194 = vector.extract_strided_slice %124 {offsets = [0, 24], sizes = [8, 8], strides = [1, 1]} : vector<8x32xf32> to vector<8x8xf32>
    %195 = vector.extract_strided_slice %125 {offsets = [0, 24], sizes = [8, 8], strides = [1, 1]} : vector<8x32xf32> to vector<8x8xf32>
    %196 = vector.extract_strided_slice %126 {offsets = [0, 24], sizes = [8, 8], strides = [1, 1]} : vector<8x32xf32> to vector<8x8xf32>
    %197 = tpu.transpose %195, [1, 0] : vector<8x8xf32> -> vector<8x8xf32>
    %cst_81 = arith.constant dense<0.000000e+00> : vector<8x8xf32>
    %198 = tpu.matmul %194, %197, %cst_81 {dimension_numbers = #tpu.dot_dimension_numbers<[1], [0], [0], [1], [0, 0, 1, 1], [], []>} : vector<8x8xf32>, vector<8x8xf32>, vector<8x8xf32> -> vector<8x8xf32>
    %cst_82 = arith.constant 0.353553385 : f32
    %199 = vector.broadcast %cst_82 : f32 to vector<8x8xf32>
    %200 = arith.mulf %198, %199 : vector<8x8xf32>
    %cst_83 = arith.constant dense<0xFF800000> : vector<8xf32>
    %201 = vector.multi_reduction <maximumf>, %200, %cst_83 [1] : vector<8x8xf32> to vector<8xf32>
    %202 = vector.shape_cast %201 : vector<8xf32> to vector<8x1xf32>
    %203 = vector.broadcast %202 : vector<8x1xf32> to vector<8x8xf32>
    %204 = arith.subf %200, %203 : vector<8x8xf32>
    %205 = math.exp %204 : vector<8x8xf32>
    %cst_84 = arith.constant dense<0.000000e+00> : vector<8xf32>
    %206 = vector.multi_reduction <add>, %205, %cst_84 [1] : vector<8x8xf32> to vector<8xf32>
    %207 = vector.shape_cast %206 : vector<8xf32> to vector<8x1xf32>
    %208 = tpu.reciprocal %207 {approx = true} : vector<8x1xf32> -> vector<8x1xf32>
    %209 = vector.broadcast %208 : vector<8x1xf32> to vector<8x8xf32>
    %210 = arith.mulf %205, %209 : vector<8x8xf32>
    %cst_85 = arith.constant dense<0.000000e+00> : vector<8x8xf32>
    %211 = tpu.matmul %210, %196, %cst_85 {dimension_numbers = #tpu.dot_dimension_numbers<[1], [0], [0], [1], [0, 0, 1, 1], [], []>} : vector<8x8xf32>, vector<8x8xf32>, vector<8x8xf32> -> vector<8x8xf32>
    %212 = vector.extract_strided_slice %6 {offsets = [24, 0], sizes = [8, 32], strides = [1, 1]} : vector<32x32xbf16> to vector<8x32xbf16>
    %213 = arith.truncf %211 : vector<8x8xf32> to vector<8x8xbf16>
    %cst_86 = arith.constant dense<0.000000e+00> : vector<8x32xf32>
    %214 = tpu.matmul %213, %212, %cst_86 {dimension_numbers = #tpu.dot_dimension_numbers<[1], [0], [0], [1], [0, 0, 1, 1], [], []>} : vector<8x8xbf16>, vector<8x32xbf16>, vector<8x32xf32> -> vector<8x32xf32>
    %215 = arith.addf %193, %214 : vector<8x32xf32>
    %216 = tpu.concatenate %123, %215 in 0 : vector<8x32xf32>, vector<8x32xf32> -> vector<16x32xf32>
    %217 = vector.broadcast %8 : vector<1x32xf32> to vector<16x32xf32>
    %218 = arith.addf %216, %217 : vector<16x32xf32>
    %219 = arith.addf %0, %218 : vector<16x32xf32>
    %cst_87 = arith.constant dense<0.000000e+00> : vector<16xf32>
    %220 = vector.multi_reduction <add>, %219, %cst_87 [1] : vector<16x32xf32> to vector<16xf32>
    %221 = vector.shape_cast %220 : vector<16xf32> to vector<16x1xf32>
    %cst_88 = arith.constant 3.200000e+01 : f32
    %222 = vector.broadcast %cst_88 : f32 to vector<16x1xf32>
    %223 = arith.divf %221, %222 : vector<16x1xf32>
    %224 = vector.broadcast %223 : vector<16x1xf32> to vector<16x32xf32>
    %225 = arith.subf %219, %224 : vector<16x32xf32>
    %226 = arith.mulf %225, %225 : vector<16x32xf32>
    %cst_89 = arith.constant dense<0.000000e+00> : vector<16xf32>
    %227 = vector.multi_reduction <add>, %226, %cst_89 [1] : vector<16x32xf32> to vector<16xf32>
    %228 = vector.shape_cast %227 : vector<16xf32> to vector<16x1xf32>
    %cst_90 = arith.constant 3.200000e+01 : f32
    %229 = vector.broadcast %cst_90 : f32 to vector<16x1xf32>
    %230 = arith.divf %228, %229 : vector<16x1xf32>
    %231 = vector.broadcast %223 : vector<16x1xf32> to vector<16x32xf32>
    %232 = arith.subf %219, %231 : vector<16x32xf32>
    %cst_91 = arith.constant 9.99999974E-6 : f32
    %233 = vector.broadcast %cst_91 : f32 to vector<16x1xf32>
    %234 = arith.addf %230, %233 : vector<16x1xf32>
    %235 = math.rsqrt %234 : vector<16x1xf32>
    %236 = vector.broadcast %235 : vector<16x1xf32> to vector<16x32xf32>
    %237 = arith.mulf %232, %236 : vector<16x32xf32>
    %238 = vector.broadcast %10 : vector<1x32xf32> to vector<16x32xf32>
    %239 = arith.mulf %237, %238 : vector<16x32xf32>
    %240 = vector.broadcast %12 : vector<1x32xf32> to vector<16x32xf32>
    %241 = arith.addf %239, %240 : vector<16x32xf32>
    %242 = arith.truncf %241 : vector<16x32xf32> to vector<16x32xbf16>
    %cst_92 = arith.constant dense<0.000000e+00> : vector<16x64xf32>
    %243 = tpu.matmul %242, %14, %cst_92 {dimension_numbers = #tpu.dot_dimension_numbers<[1], [0], [0], [1], [0, 0, 1, 1], [], []>} : vector<16x32xbf16>, vector<32x64xbf16>, vector<16x64xf32> -> vector<16x64xf32>
    %244 = vector.broadcast %16 : vector<1x64xf32> to vector<16x64xf32>
    %245 = arith.addf %243, %244 : vector<16x64xf32>
    %cst_93 = arith.constant 0.000000e+00 : f32
    %246 = vector.broadcast %cst_93 : f32 to vector<16x64xf32>
    %247 = arith.maximumf %245, %246 : vector<16x64xf32>
    %248 = arith.truncf %247 : vector<16x64xf32> to vector<16x64xbf16>
    %cst_94 = arith.constant dense<0.000000e+00> : vector<16x32xf32>
    %249 = tpu.matmul %248, %18, %cst_94 {dimension_numbers = #tpu.dot_dimension_numbers<[1], [0], [0], [1], [0, 0, 1, 1], [], []>} : vector<16x64xbf16>, vector<64x32xbf16>, vector<16x32xf32> -> vector<16x32xf32>
    %250 = vector.broadcast %20 : vector<1x32xf32> to vector<16x32xf32>
    %251 = arith.addf %249, %250 : vector<16x32xf32>
    %252 = arith.addf %241, %251 : vector<16x32xf32>
    %cst_95 = arith.constant dense<0.000000e+00> : vector<16xf32>
    %253 = vector.multi_reduction <add>, %252, %cst_95 [1] : vector<16x32xf32> to vector<16xf32>
    %254 = vector.shape_cast %253 : vector<16xf32> to vector<16x1xf32>
    %cst_96 = arith.constant 3.200000e+01 : f32
    %255 = vector.broadcast %cst_96 : f32 to vector<16x1xf32>
    %256 = arith.divf %254, %255 : vector<16x1xf32>
    %257 = vector.broadcast %256 : vector<16x1xf32> to vector<16x32xf32>
    %258 = arith.subf %252, %257 : vector<16x32xf32>
    %259 = arith.mulf %258, %258 : vector<16x32xf32>
    %cst_97 = arith.constant dense<0.000000e+00> : vector<16xf32>
    %260 = vector.multi_reduction <add>, %259, %cst_97 [1] : vector<16x32xf32> to vector<16xf32>
    %261 = vector.shape_cast %260 : vector<16xf32> to vector<16x1xf32>
    %cst_98 = arith.constant 3.200000e+01 : f32
    %262 = vector.broadcast %cst_98 : f32 to vector<16x1xf32>
    %263 = arith.divf %261, %262 : vector<16x1xf32>
    %264 = vector.broadcast %256 : vector<16x1xf32> to vector<16x32xf32>
    %265 = arith.subf %252, %264 : vector<16x32xf32>
    %cst_99 = arith.constant 9.99999974E-6 : f32
    %266 = vector.broadcast %cst_99 : f32 to vector<16x1xf32>
    %267 = arith.addf %263, %266 : vector<16x1xf32>
    %268 = math.rsqrt %267 : vector<16x1xf32>
    %269 = vector.broadcast %268 : vector<16x1xf32> to vector<16x32xf32>
    %270 = arith.mulf %265, %269 : vector<16x32xf32>
    %271 = vector.broadcast %22 : vector<1x32xf32> to vector<16x32xf32>
    %272 = arith.mulf %270, %271 : vector<16x32xf32>
    %273 = vector.broadcast %24 : vector<1x32xf32> to vector<16x32xf32>
    %274 = arith.addf %272, %273 : vector<16x32xf32>
    %c1 = arith.constant 1 : index
    %c0_100 = arith.constant 0 : index
    %c0_101 = arith.constant 0 : index
    %275 = vector.load %arg1[%c1, %c0_100, %c0_101] : memref<2x32x96xbf16, #tpu.memory_space<vmem>>, vector<1x32x96xbf16>
    %276 = vector.shape_cast %275 : vector<1x32x96xbf16> to vector<32x96xbf16>
    %c1_102 = arith.constant 1 : index
    %c0_103 = arith.constant 0 : index
    %c0_104 = arith.constant 0 : index
    %277 = vector.load %arg2[%c1_102, %c0_103, %c0_104] : memref<2x1x96xf32, #tpu.memory_space<vmem>>, vector<1x1x96xf32>
    %278 = vector.shape_cast %277 : vector<1x1x96xf32> to vector<1x96xf32>
    %c1_105 = arith.constant 1 : index
    %c0_106 = arith.constant 0 : index
    %c0_107 = arith.constant 0 : index
    %279 = vector.load %arg3[%c1_105, %c0_106, %c0_107] : memref<2x32x32xbf16, #tpu.memory_space<vmem>>, vector<1x32x32xbf16>
    %280 = vector.shape_cast %279 : vector<1x32x32xbf16> to vector<32x32xbf16>
    %c1_108 = arith.constant 1 : index
    %c0_109 = arith.constant 0 : index
    %c0_110 = arith.constant 0 : index
    %281 = vector.load %arg4[%c1_108, %c0_109, %c0_110] : memref<2x1x32xf32, #tpu.memory_space<vmem>>, vector<1x1x32xf32>
    %282 = vector.shape_cast %281 : vector<1x1x32xf32> to vector<1x32xf32>
    %c1_111 = arith.constant 1 : index
    %c0_112 = arith.constant 0 : index
    %c0_113 = arith.constant 0 : index
    %283 = vector.load %arg5[%c1_111, %c0_112, %c0_113] : memref<2x1x32xf32, #tpu.memory_space<vmem>>, vector<1x1x32xf32>
    %284 = vector.shape_cast %283 : vector<1x1x32xf32> to vector<1x32xf32>
    %c1_114 = arith.constant 1 : index
    %c0_115 = arith.constant 0 : index
    %c0_116 = arith.constant 0 : index
    %285 = vector.load %arg6[%c1_114, %c0_115, %c0_116] : memref<2x1x32xf32, #tpu.memory_space<vmem>>, vector<1x1x32xf32>
    %286 = vector.shape_cast %285 : vector<1x1x32xf32> to vector<1x32xf32>
    %c1_117 = arith.constant 1 : index
    %c0_118 = arith.constant 0 : index
    %c0_119 = arith.constant 0 : index
    %287 = vector.load %arg7[%c1_117, %c0_118, %c0_119] : memref<2x32x64xbf16, #tpu.memory_space<vmem>>, vector<1x32x64xbf16>
    %288 = vector.shape_cast %287 : vector<1x32x64xbf16> to vector<32x64xbf16>
    %c1_120 = arith.constant 1 : index
    %c0_121 = arith.constant 0 : index
    %c0_122 = arith.constant 0 : index
    %289 = vector.load %arg8[%c1_120, %c0_121, %c0_122] : memref<2x1x64xf32, #tpu.memory_space<vmem>>, vector<1x1x64xf32>
    %290 = vector.shape_cast %289 : vector<1x1x64xf32> to vector<1x64xf32>
    %c1_123 = arith.constant 1 : index
    %c0_124 = arith.constant 0 : index
    %c0_125 = arith.constant 0 : index
    %291 = vector.load %arg9[%c1_123, %c0_124, %c0_125] : memref<2x64x32xbf16, #tpu.memory_space<vmem>>, vector<1x64x32xbf16>
    %292 = vector.shape_cast %291 : vector<1x64x32xbf16> to vector<64x32xbf16>
    %c1_126 = arith.constant 1 : index
    %c0_127 = arith.constant 0 : index
    %c0_128 = arith.constant 0 : index
    %293 = vector.load %arg10[%c1_126, %c0_127, %c0_128] : memref<2x1x32xf32, #tpu.memory_space<vmem>>, vector<1x1x32xf32>
    %294 = vector.shape_cast %293 : vector<1x1x32xf32> to vector<1x32xf32>
    %c1_129 = arith.constant 1 : index
    %c0_130 = arith.constant 0 : index
    %c0_131 = arith.constant 0 : index
    %295 = vector.load %arg11[%c1_129, %c0_130, %c0_131] : memref<2x1x32xf32, #tpu.memory_space<vmem>>, vector<1x1x32xf32>
    %296 = vector.shape_cast %295 : vector<1x1x32xf32> to vector<1x32xf32>
    %c1_132 = arith.constant 1 : index
    %c0_133 = arith.constant 0 : index
    %c0_134 = arith.constant 0 : index
    %297 = vector.load %arg12[%c1_132, %c0_133, %c0_134] : memref<2x1x32xf32, #tpu.memory_space<vmem>>, vector<1x1x32xf32>
    %298 = vector.shape_cast %297 : vector<1x1x32xf32> to vector<1x32xf32>
    %299 = arith.truncf %274 : vector<16x32xf32> to vector<16x32xbf16>
    %cst_135 = arith.constant dense<0.000000e+00> : vector<16x96xf32>
    %300 = tpu.matmul %299, %276, %cst_135 {dimension_numbers = #tpu.dot_dimension_numbers<[1], [0], [0], [1], [0, 0, 1, 1], [], []>} : vector<16x32xbf16>, vector<32x96xbf16>, vector<16x96xf32> -> vector<16x96xf32>
    %301 = vector.broadcast %278 : vector<1x96xf32> to vector<16x96xf32>
    %302 = arith.addf %300, %301 : vector<16x96xf32>
    %303 = vector.extract_strided_slice %302 {offsets = [0, 0], sizes = [16, 32], strides = [1, 1]} : vector<16x96xf32> to vector<16x32xf32>
    %304 = vector.extract_strided_slice %302 {offsets = [0, 32], sizes = [16, 32], strides = [1, 1]} : vector<16x96xf32> to vector<16x32xf32>
    %305 = vector.extract_strided_slice %302 {offsets = [0, 64], sizes = [16, 32], strides = [1, 1]} : vector<16x96xf32> to vector<16x32xf32>
    %306 = vector.extract_strided_slice %303 {offsets = [0, 0], sizes = [8, 32], strides = [1, 1]} : vector<16x32xf32> to vector<8x32xf32>
    %307 = vector.extract_strided_slice %304 {offsets = [0, 0], sizes = [8, 32], strides = [1, 1]} : vector<16x32xf32> to vector<8x32xf32>
    %308 = vector.extract_strided_slice %305 {offsets = [0, 0], sizes = [8, 32], strides = [1, 1]} : vector<16x32xf32> to vector<8x32xf32>
    %cst_136 = arith.constant 0.000000e+00 : f32
    %309 = vector.broadcast %cst_136 : f32 to vector<8x32xf32>
    %310 = vector.extract_strided_slice %306 {offsets = [0, 0], sizes = [8, 8], strides = [1, 1]} : vector<8x32xf32> to vector<8x8xf32>
    %311 = vector.extract_strided_slice %307 {offsets = [0, 0], sizes = [8, 8], strides = [1, 1]} : vector<8x32xf32> to vector<8x8xf32>
    %312 = vector.extract_strided_slice %308 {offsets = [0, 0], sizes = [8, 8], strides = [1, 1]} : vector<8x32xf32> to vector<8x8xf32>
    %313 = tpu.transpose %311, [1, 0] : vector<8x8xf32> -> vector<8x8xf32>
    %cst_137 = arith.constant dense<0.000000e+00> : vector<8x8xf32>
    %314 = tpu.matmul %310, %313, %cst_137 {dimension_numbers = #tpu.dot_dimension_numbers<[1], [0], [0], [1], [0, 0, 1, 1], [], []>} : vector<8x8xf32>, vector<8x8xf32>, vector<8x8xf32> -> vector<8x8xf32>
    %cst_138 = arith.constant 0.353553385 : f32
    %315 = vector.broadcast %cst_138 : f32 to vector<8x8xf32>
    %316 = arith.mulf %314, %315 : vector<8x8xf32>
    %cst_139 = arith.constant dense<0xFF800000> : vector<8xf32>
    %317 = vector.multi_reduction <maximumf>, %316, %cst_139 [1] : vector<8x8xf32> to vector<8xf32>
    %318 = vector.shape_cast %317 : vector<8xf32> to vector<8x1xf32>
    %319 = vector.broadcast %318 : vector<8x1xf32> to vector<8x8xf32>
    %320 = arith.subf %316, %319 : vector<8x8xf32>
    %321 = math.exp %320 : vector<8x8xf32>
    %cst_140 = arith.constant dense<0.000000e+00> : vector<8xf32>
    %322 = vector.multi_reduction <add>, %321, %cst_140 [1] : vector<8x8xf32> to vector<8xf32>
    %323 = vector.shape_cast %322 : vector<8xf32> to vector<8x1xf32>
    %324 = tpu.reciprocal %323 {approx = true} : vector<8x1xf32> -> vector<8x1xf32>
    %325 = vector.broadcast %324 : vector<8x1xf32> to vector<8x8xf32>
    %326 = arith.mulf %321, %325 : vector<8x8xf32>
    %cst_141 = arith.constant dense<0.000000e+00> : vector<8x8xf32>
    %327 = tpu.matmul %326, %312, %cst_141 {dimension_numbers = #tpu.dot_dimension_numbers<[1], [0], [0], [1], [0, 0, 1, 1], [], []>} : vector<8x8xf32>, vector<8x8xf32>, vector<8x8xf32> -> vector<8x8xf32>
    %328 = vector.extract_strided_slice %280 {offsets = [0, 0], sizes = [8, 32], strides = [1, 1]} : vector<32x32xbf16> to vector<8x32xbf16>
    %329 = arith.truncf %327 : vector<8x8xf32> to vector<8x8xbf16>
    %cst_142 = arith.constant dense<0.000000e+00> : vector<8x32xf32>
    %330 = tpu.matmul %329, %328, %cst_142 {dimension_numbers = #tpu.dot_dimension_numbers<[1], [0], [0], [1], [0, 0, 1, 1], [], []>} : vector<8x8xbf16>, vector<8x32xbf16>, vector<8x32xf32> -> vector<8x32xf32>
    %331 = arith.addf %309, %330 : vector<8x32xf32>
    %332 = vector.extract_strided_slice %306 {offsets = [0, 8], sizes = [8, 8], strides = [1, 1]} : vector<8x32xf32> to vector<8x8xf32>
    %333 = vector.extract_strided_slice %307 {offsets = [0, 8], sizes = [8, 8], strides = [1, 1]} : vector<8x32xf32> to vector<8x8xf32>
    %334 = vector.extract_strided_slice %308 {offsets = [0, 8], sizes = [8, 8], strides = [1, 1]} : vector<8x32xf32> to vector<8x8xf32>
    %335 = tpu.transpose %333, [1, 0] : vector<8x8xf32> -> vector<8x8xf32>
    %cst_143 = arith.constant dense<0.000000e+00> : vector<8x8xf32>
    %336 = tpu.matmul %332, %335, %cst_143 {dimension_numbers = #tpu.dot_dimension_numbers<[1], [0], [0], [1], [0, 0, 1, 1], [], []>} : vector<8x8xf32>, vector<8x8xf32>, vector<8x8xf32> -> vector<8x8xf32>
    %cst_144 = arith.constant 0.353553385 : f32
    %337 = vector.broadcast %cst_144 : f32 to vector<8x8xf32>
    %338 = arith.mulf %336, %337 : vector<8x8xf32>
    %cst_145 = arith.constant dense<0xFF800000> : vector<8xf32>
    %339 = vector.multi_reduction <maximumf>, %338, %cst_145 [1] : vector<8x8xf32> to vector<8xf32>
    %340 = vector.shape_cast %339 : vector<8xf32> to vector<8x1xf32>
    %341 = vector.broadcast %340 : vector<8x1xf32> to vector<8x8xf32>
    %342 = arith.subf %338, %341 : vector<8x8xf32>
    %343 = math.exp %342 : vector<8x8xf32>
    %cst_146 = arith.constant dense<0.000000e+00> : vector<8xf32>
    %344 = vector.multi_reduction <add>, %343, %cst_146 [1] : vector<8x8xf32> to vector<8xf32>
    %345 = vector.shape_cast %344 : vector<8xf32> to vector<8x1xf32>
    %346 = tpu.reciprocal %345 {approx = true} : vector<8x1xf32> -> vector<8x1xf32>
    %347 = vector.broadcast %346 : vector<8x1xf32> to vector<8x8xf32>
    %348 = arith.mulf %343, %347 : vector<8x8xf32>
    %cst_147 = arith.constant dense<0.000000e+00> : vector<8x8xf32>
    %349 = tpu.matmul %348, %334, %cst_147 {dimension_numbers = #tpu.dot_dimension_numbers<[1], [0], [0], [1], [0, 0, 1, 1], [], []>} : vector<8x8xf32>, vector<8x8xf32>, vector<8x8xf32> -> vector<8x8xf32>
    %350 = vector.extract_strided_slice %280 {offsets = [8, 0], sizes = [8, 32], strides = [1, 1]} : vector<32x32xbf16> to vector<8x32xbf16>
    %351 = arith.truncf %349 : vector<8x8xf32> to vector<8x8xbf16>
    %cst_148 = arith.constant dense<0.000000e+00> : vector<8x32xf32>
    %352 = tpu.matmul %351, %350, %cst_148 {dimension_numbers = #tpu.dot_dimension_numbers<[1], [0], [0], [1], [0, 0, 1, 1], [], []>} : vector<8x8xbf16>, vector<8x32xbf16>, vector<8x32xf32> -> vector<8x32xf32>
    %353 = arith.addf %331, %352 : vector<8x32xf32>
    %354 = vector.extract_strided_slice %306 {offsets = [0, 16], sizes = [8, 8], strides = [1, 1]} : vector<8x32xf32> to vector<8x8xf32>
    %355 = vector.extract_strided_slice %307 {offsets = [0, 16], sizes = [8, 8], strides = [1, 1]} : vector<8x32xf32> to vector<8x8xf32>
    %356 = vector.extract_strided_slice %308 {offsets = [0, 16], sizes = [8, 8], strides = [1, 1]} : vector<8x32xf32> to vector<8x8xf32>
    %357 = tpu.transpose %355, [1, 0] : vector<8x8xf32> -> vector<8x8xf32>
    %cst_149 = arith.constant dense<0.000000e+00> : vector<8x8xf32>
    %358 = tpu.matmul %354, %357, %cst_149 {dimension_numbers = #tpu.dot_dimension_numbers<[1], [0], [0], [1], [0, 0, 1, 1], [], []>} : vector<8x8xf32>, vector<8x8xf32>, vector<8x8xf32> -> vector<8x8xf32>
    %cst_150 = arith.constant 0.353553385 : f32
    %359 = vector.broadcast %cst_150 : f32 to vector<8x8xf32>
    %360 = arith.mulf %358, %359 : vector<8x8xf32>
    %cst_151 = arith.constant dense<0xFF800000> : vector<8xf32>
    %361 = vector.multi_reduction <maximumf>, %360, %cst_151 [1] : vector<8x8xf32> to vector<8xf32>
    %362 = vector.shape_cast %361 : vector<8xf32> to vector<8x1xf32>
    %363 = vector.broadcast %362 : vector<8x1xf32> to vector<8x8xf32>
    %364 = arith.subf %360, %363 : vector<8x8xf32>
    %365 = math.exp %364 : vector<8x8xf32>
    %cst_152 = arith.constant dense<0.000000e+00> : vector<8xf32>
    %366 = vector.multi_reduction <add>, %365, %cst_152 [1] : vector<8x8xf32> to vector<8xf32>
    %367 = vector.shape_cast %366 : vector<8xf32> to vector<8x1xf32>
    %368 = tpu.reciprocal %367 {approx = true} : vector<8x1xf32> -> vector<8x1xf32>
    %369 = vector.broadcast %368 : vector<8x1xf32> to vector<8x8xf32>
    %370 = arith.mulf %365, %369 : vector<8x8xf32>
    %cst_153 = arith.constant dense<0.000000e+00> : vector<8x8xf32>
    %371 = tpu.matmul %370, %356, %cst_153 {dimension_numbers = #tpu.dot_dimension_numbers<[1], [0], [0], [1], [0, 0, 1, 1], [], []>} : vector<8x8xf32>, vector<8x8xf32>, vector<8x8xf32> -> vector<8x8xf32>
    %372 = vector.extract_strided_slice %280 {offsets = [16, 0], sizes = [8, 32], strides = [1, 1]} : vector<32x32xbf16> to vector<8x32xbf16>
    %373 = arith.truncf %371 : vector<8x8xf32> to vector<8x8xbf16>
    %cst_154 = arith.constant dense<0.000000e+00> : vector<8x32xf32>
    %374 = tpu.matmul %373, %372, %cst_154 {dimension_numbers = #tpu.dot_dimension_numbers<[1], [0], [0], [1], [0, 0, 1, 1], [], []>} : vector<8x8xbf16>, vector<8x32xbf16>, vector<8x32xf32> -> vector<8x32xf32>
    %375 = arith.addf %353, %374 : vector<8x32xf32>
    %376 = vector.extract_strided_slice %306 {offsets = [0, 24], sizes = [8, 8], strides = [1, 1]} : vector<8x32xf32> to vector<8x8xf32>
    %377 = vector.extract_strided_slice %307 {offsets = [0, 24], sizes = [8, 8], strides = [1, 1]} : vector<8x32xf32> to vector<8x8xf32>
    %378 = vector.extract_strided_slice %308 {offsets = [0, 24], sizes = [8, 8], strides = [1, 1]} : vector<8x32xf32> to vector<8x8xf32>
    %379 = tpu.transpose %377, [1, 0] : vector<8x8xf32> -> vector<8x8xf32>
    %cst_155 = arith.constant dense<0.000000e+00> : vector<8x8xf32>
    %380 = tpu.matmul %376, %379, %cst_155 {dimension_numbers = #tpu.dot_dimension_numbers<[1], [0], [0], [1], [0, 0, 1, 1], [], []>} : vector<8x8xf32>, vector<8x8xf32>, vector<8x8xf32> -> vector<8x8xf32>
    %cst_156 = arith.constant 0.353553385 : f32
    %381 = vector.broadcast %cst_156 : f32 to vector<8x8xf32>
    %382 = arith.mulf %380, %381 : vector<8x8xf32>
    %cst_157 = arith.constant dense<0xFF800000> : vector<8xf32>
    %383 = vector.multi_reduction <maximumf>, %382, %cst_157 [1] : vector<8x8xf32> to vector<8xf32>
    %384 = vector.shape_cast %383 : vector<8xf32> to vector<8x1xf32>
    %385 = vector.broadcast %384 : vector<8x1xf32> to vector<8x8xf32>
    %386 = arith.subf %382, %385 : vector<8x8xf32>
    %387 = math.exp %386 : vector<8x8xf32>
    %cst_158 = arith.constant dense<0.000000e+00> : vector<8xf32>
    %388 = vector.multi_reduction <add>, %387, %cst_158 [1] : vector<8x8xf32> to vector<8xf32>
    %389 = vector.shape_cast %388 : vector<8xf32> to vector<8x1xf32>
    %390 = tpu.reciprocal %389 {approx = true} : vector<8x1xf32> -> vector<8x1xf32>
    %391 = vector.broadcast %390 : vector<8x1xf32> to vector<8x8xf32>
    %392 = arith.mulf %387, %391 : vector<8x8xf32>
    %cst_159 = arith.constant dense<0.000000e+00> : vector<8x8xf32>
    %393 = tpu.matmul %392, %378, %cst_159 {dimension_numbers = #tpu.dot_dimension_numbers<[1], [0], [0], [1], [0, 0, 1, 1], [], []>} : vector<8x8xf32>, vector<8x8xf32>, vector<8x8xf32> -> vector<8x8xf32>
    %394 = vector.extract_strided_slice %280 {offsets = [24, 0], sizes = [8, 32], strides = [1, 1]} : vector<32x32xbf16> to vector<8x32xbf16>
    %395 = arith.truncf %393 : vector<8x8xf32> to vector<8x8xbf16>
    %cst_160 = arith.constant dense<0.000000e+00> : vector<8x32xf32>
    %396 = tpu.matmul %395, %394, %cst_160 {dimension_numbers = #tpu.dot_dimension_numbers<[1], [0], [0], [1], [0, 0, 1, 1], [], []>} : vector<8x8xbf16>, vector<8x32xbf16>, vector<8x32xf32> -> vector<8x32xf32>
    %397 = arith.addf %375, %396 : vector<8x32xf32>
    %398 = vector.extract_strided_slice %303 {offsets = [8, 0], sizes = [8, 32], strides = [1, 1]} : vector<16x32xf32> to vector<8x32xf32>
    %399 = vector.extract_strided_slice %304 {offsets = [8, 0], sizes = [8, 32], strides = [1, 1]} : vector<16x32xf32> to vector<8x32xf32>
    %400 = vector.extract_strided_slice %305 {offsets = [8, 0], sizes = [8, 32], strides = [1, 1]} : vector<16x32xf32> to vector<8x32xf32>
    %cst_161 = arith.constant 0.000000e+00 : f32
    %401 = vector.broadcast %cst_161 : f32 to vector<8x32xf32>
    %402 = vector.extract_strided_slice %398 {offsets = [0, 0], sizes = [8, 8], strides = [1, 1]} : vector<8x32xf32> to vector<8x8xf32>
    %403 = vector.extract_strided_slice %399 {offsets = [0, 0], sizes = [8, 8], strides = [1, 1]} : vector<8x32xf32> to vector<8x8xf32>
    %404 = vector.extract_strided_slice %400 {offsets = [0, 0], sizes = [8, 8], strides = [1, 1]} : vector<8x32xf32> to vector<8x8xf32>
    %405 = tpu.transpose %403, [1, 0] : vector<8x8xf32> -> vector<8x8xf32>
    %cst_162 = arith.constant dense<0.000000e+00> : vector<8x8xf32>
    %406 = tpu.matmul %402, %405, %cst_162 {dimension_numbers = #tpu.dot_dimension_numbers<[1], [0], [0], [1], [0, 0, 1, 1], [], []>} : vector<8x8xf32>, vector<8x8xf32>, vector<8x8xf32> -> vector<8x8xf32>
    %cst_163 = arith.constant 0.353553385 : f32
    %407 = vector.broadcast %cst_163 : f32 to vector<8x8xf32>
    %408 = arith.mulf %406, %407 : vector<8x8xf32>
    %cst_164 = arith.constant dense<0xFF800000> : vector<8xf32>
    %409 = vector.multi_reduction <maximumf>, %408, %cst_164 [1] : vector<8x8xf32> to vector<8xf32>
    %410 = vector.shape_cast %409 : vector<8xf32> to vector<8x1xf32>
    %411 = vector.broadcast %410 : vector<8x1xf32> to vector<8x8xf32>
    %412 = arith.subf %408, %411 : vector<8x8xf32>
    %413 = math.exp %412 : vector<8x8xf32>
    %cst_165 = arith.constant dense<0.000000e+00> : vector<8xf32>
    %414 = vector.multi_reduction <add>, %413, %cst_165 [1] : vector<8x8xf32> to vector<8xf32>
    %415 = vector.shape_cast %414 : vector<8xf32> to vector<8x1xf32>
    %416 = tpu.reciprocal %415 {approx = true} : vector<8x1xf32> -> vector<8x1xf32>
    %417 = vector.broadcast %416 : vector<8x1xf32> to vector<8x8xf32>
    %418 = arith.mulf %413, %417 : vector<8x8xf32>
    %cst_166 = arith.constant dense<0.000000e+00> : vector<8x8xf32>
    %419 = tpu.matmul %418, %404, %cst_166 {dimension_numbers = #tpu.dot_dimension_numbers<[1], [0], [0], [1], [0, 0, 1, 1], [], []>} : vector<8x8xf32>, vector<8x8xf32>, vector<8x8xf32> -> vector<8x8xf32>
    %420 = vector.extract_strided_slice %280 {offsets = [0, 0], sizes = [8, 32], strides = [1, 1]} : vector<32x32xbf16> to vector<8x32xbf16>
    %421 = arith.truncf %419 : vector<8x8xf32> to vector<8x8xbf16>
    %cst_167 = arith.constant dense<0.000000e+00> : vector<8x32xf32>
    %422 = tpu.matmul %421, %420, %cst_167 {dimension_numbers = #tpu.dot_dimension_numbers<[1], [0], [0], [1], [0, 0, 1, 1], [], []>} : vector<8x8xbf16>, vector<8x32xbf16>, vector<8x32xf32> -> vector<8x32xf32>
    %423 = arith.addf %401, %422 : vector<8x32xf32>
    %424 = vector.extract_strided_slice %398 {offsets = [0, 8], sizes = [8, 8], strides = [1, 1]} : vector<8x32xf32> to vector<8x8xf32>
    %425 = vector.extract_strided_slice %399 {offsets = [0, 8], sizes = [8, 8], strides = [1, 1]} : vector<8x32xf32> to vector<8x8xf32>
    %426 = vector.extract_strided_slice %400 {offsets = [0, 8], sizes = [8, 8], strides = [1, 1]} : vector<8x32xf32> to vector<8x8xf32>
    %427 = tpu.transpose %425, [1, 0] : vector<8x8xf32> -> vector<8x8xf32>
    %cst_168 = arith.constant dense<0.000000e+00> : vector<8x8xf32>
    %428 = tpu.matmul %424, %427, %cst_168 {dimension_numbers = #tpu.dot_dimension_numbers<[1], [0], [0], [1], [0, 0, 1, 1], [], []>} : vector<8x8xf32>, vector<8x8xf32>, vector<8x8xf32> -> vector<8x8xf32>
    %cst_169 = arith.constant 0.353553385 : f32
    %429 = vector.broadcast %cst_169 : f32 to vector<8x8xf32>
    %430 = arith.mulf %428, %429 : vector<8x8xf32>
    %cst_170 = arith.constant dense<0xFF800000> : vector<8xf32>
    %431 = vector.multi_reduction <maximumf>, %430, %cst_170 [1] : vector<8x8xf32> to vector<8xf32>
    %432 = vector.shape_cast %431 : vector<8xf32> to vector<8x1xf32>
    %433 = vector.broadcast %432 : vector<8x1xf32> to vector<8x8xf32>
    %434 = arith.subf %430, %433 : vector<8x8xf32>
    %435 = math.exp %434 : vector<8x8xf32>
    %cst_171 = arith.constant dense<0.000000e+00> : vector<8xf32>
    %436 = vector.multi_reduction <add>, %435, %cst_171 [1] : vector<8x8xf32> to vector<8xf32>
    %437 = vector.shape_cast %436 : vector<8xf32> to vector<8x1xf32>
    %438 = tpu.reciprocal %437 {approx = true} : vector<8x1xf32> -> vector<8x1xf32>
    %439 = vector.broadcast %438 : vector<8x1xf32> to vector<8x8xf32>
    %440 = arith.mulf %435, %439 : vector<8x8xf32>
    %cst_172 = arith.constant dense<0.000000e+00> : vector<8x8xf32>
    %441 = tpu.matmul %440, %426, %cst_172 {dimension_numbers = #tpu.dot_dimension_numbers<[1], [0], [0], [1], [0, 0, 1, 1], [], []>} : vector<8x8xf32>, vector<8x8xf32>, vector<8x8xf32> -> vector<8x8xf32>
    %442 = vector.extract_strided_slice %280 {offsets = [8, 0], sizes = [8, 32], strides = [1, 1]} : vector<32x32xbf16> to vector<8x32xbf16>
    %443 = arith.truncf %441 : vector<8x8xf32> to vector<8x8xbf16>
    %cst_173 = arith.constant dense<0.000000e+00> : vector<8x32xf32>
    %444 = tpu.matmul %443, %442, %cst_173 {dimension_numbers = #tpu.dot_dimension_numbers<[1], [0], [0], [1], [0, 0, 1, 1], [], []>} : vector<8x8xbf16>, vector<8x32xbf16>, vector<8x32xf32> -> vector<8x32xf32>
    %445 = arith.addf %423, %444 : vector<8x32xf32>
    %446 = vector.extract_strided_slice %398 {offsets = [0, 16], sizes = [8, 8], strides = [1, 1]} : vector<8x32xf32> to vector<8x8xf32>
    %447 = vector.extract_strided_slice %399 {offsets = [0, 16], sizes = [8, 8], strides = [1, 1]} : vector<8x32xf32> to vector<8x8xf32>
    %448 = vector.extract_strided_slice %400 {offsets = [0, 16], sizes = [8, 8], strides = [1, 1]} : vector<8x32xf32> to vector<8x8xf32>
    %449 = tpu.transpose %447, [1, 0] : vector<8x8xf32> -> vector<8x8xf32>
    %cst_174 = arith.constant dense<0.000000e+00> : vector<8x8xf32>
    %450 = tpu.matmul %446, %449, %cst_174 {dimension_numbers = #tpu.dot_dimension_numbers<[1], [0], [0], [1], [0, 0, 1, 1], [], []>} : vector<8x8xf32>, vector<8x8xf32>, vector<8x8xf32> -> vector<8x8xf32>
    %cst_175 = arith.constant 0.353553385 : f32
    %451 = vector.broadcast %cst_175 : f32 to vector<8x8xf32>
    %452 = arith.mulf %450, %451 : vector<8x8xf32>
    %cst_176 = arith.constant dense<0xFF800000> : vector<8xf32>
    %453 = vector.multi_reduction <maximumf>, %452, %cst_176 [1] : vector<8x8xf32> to vector<8xf32>
    %454 = vector.shape_cast %453 : vector<8xf32> to vector<8x1xf32>
    %455 = vector.broadcast %454 : vector<8x1xf32> to vector<8x8xf32>
    %456 = arith.subf %452, %455 : vector<8x8xf32>
    %457 = math.exp %456 : vector<8x8xf32>
    %cst_177 = arith.constant dense<0.000000e+00> : vector<8xf32>
    %458 = vector.multi_reduction <add>, %457, %cst_177 [1] : vector<8x8xf32> to vector<8xf32>
    %459 = vector.shape_cast %458 : vector<8xf32> to vector<8x1xf32>
    %460 = tpu.reciprocal %459 {approx = true} : vector<8x1xf32> -> vector<8x1xf32>
    %461 = vector.broadcast %460 : vector<8x1xf32> to vector<8x8xf32>
    %462 = arith.mulf %457, %461 : vector<8x8xf32>
    %cst_178 = arith.constant dense<0.000000e+00> : vector<8x8xf32>
    %463 = tpu.matmul %462, %448, %cst_178 {dimension_numbers = #tpu.dot_dimension_numbers<[1], [0], [0], [1], [0, 0, 1, 1], [], []>} : vector<8x8xf32>, vector<8x8xf32>, vector<8x8xf32> -> vector<8x8xf32>
    %464 = vector.extract_strided_slice %280 {offsets = [16, 0], sizes = [8, 32], strides = [1, 1]} : vector<32x32xbf16> to vector<8x32xbf16>
    %465 = arith.truncf %463 : vector<8x8xf32> to vector<8x8xbf16>
    %cst_179 = arith.constant dense<0.000000e+00> : vector<8x32xf32>
    %466 = tpu.matmul %465, %464, %cst_179 {dimension_numbers = #tpu.dot_dimension_numbers<[1], [0], [0], [1], [0, 0, 1, 1], [], []>} : vector<8x8xbf16>, vector<8x32xbf16>, vector<8x32xf32> -> vector<8x32xf32>
    %467 = arith.addf %445, %466 : vector<8x32xf32>
    %468 = vector.extract_strided_slice %398 {offsets = [0, 24], sizes = [8, 8], strides = [1, 1]} : vector<8x32xf32> to vector<8x8xf32>
    %469 = vector.extract_strided_slice %399 {offsets = [0, 24], sizes = [8, 8], strides = [1, 1]} : vector<8x32xf32> to vector<8x8xf32>
    %470 = vector.extract_strided_slice %400 {offsets = [0, 24], sizes = [8, 8], strides = [1, 1]} : vector<8x32xf32> to vector<8x8xf32>
    %471 = tpu.transpose %469, [1, 0] : vector<8x8xf32> -> vector<8x8xf32>
    %cst_180 = arith.constant dense<0.000000e+00> : vector<8x8xf32>
    %472 = tpu.matmul %468, %471, %cst_180 {dimension_numbers = #tpu.dot_dimension_numbers<[1], [0], [0], [1], [0, 0, 1, 1], [], []>} : vector<8x8xf32>, vector<8x8xf32>, vector<8x8xf32> -> vector<8x8xf32>
    %cst_181 = arith.constant 0.353553385 : f32
    %473 = vector.broadcast %cst_181 : f32 to vector<8x8xf32>
    %474 = arith.mulf %472, %473 : vector<8x8xf32>
    %cst_182 = arith.constant dense<0xFF800000> : vector<8xf32>
    %475 = vector.multi_reduction <maximumf>, %474, %cst_182 [1] : vector<8x8xf32> to vector<8xf32>
    %476 = vector.shape_cast %475 : vector<8xf32> to vector<8x1xf32>
    %477 = vector.broadcast %476 : vector<8x1xf32> to vector<8x8xf32>
    %478 = arith.subf %474, %477 : vector<8x8xf32>
    %479 = math.exp %478 : vector<8x8xf32>
    %cst_183 = arith.constant dense<0.000000e+00> : vector<8xf32>
    %480 = vector.multi_reduction <add>, %479, %cst_183 [1] : vector<8x8xf32> to vector<8xf32>
    %481 = vector.shape_cast %480 : vector<8xf32> to vector<8x1xf32>
    %482 = tpu.reciprocal %481 {approx = true} : vector<8x1xf32> -> vector<8x1xf32>
    %483 = vector.broadcast %482 : vector<8x1xf32> to vector<8x8xf32>
    %484 = arith.mulf %479, %483 : vector<8x8xf32>
    %cst_184 = arith.constant dense<0.000000e+00> : vector<8x8xf32>
    %485 = tpu.matmul %484, %470, %cst_184 {dimension_numbers = #tpu.dot_dimension_numbers<[1], [0], [0], [1], [0, 0, 1, 1], [], []>} : vector<8x8xf32>, vector<8x8xf32>, vector<8x8xf32> -> vector<8x8xf32>
    %486 = vector.extract_strided_slice %280 {offsets = [24, 0], sizes = [8, 32], strides = [1, 1]} : vector<32x32xbf16> to vector<8x32xbf16>
    %487 = arith.truncf %485 : vector<8x8xf32> to vector<8x8xbf16>
    %cst_185 = arith.constant dense<0.000000e+00> : vector<8x32xf32>
    %488 = tpu.matmul %487, %486, %cst_185 {dimension_numbers = #tpu.dot_dimension_numbers<[1], [0], [0], [1], [0, 0, 1, 1], [], []>} : vector<8x8xbf16>, vector<8x32xbf16>, vector<8x32xf32> -> vector<8x32xf32>
    %489 = arith.addf %467, %488 : vector<8x32xf32>
    %490 = tpu.concatenate %397, %489 in 0 : vector<8x32xf32>, vector<8x32xf32> -> vector<16x32xf32>
    %491 = vector.broadcast %282 : vector<1x32xf32> to vector<16x32xf32>
    %492 = arith.addf %490, %491 : vector<16x32xf32>
    %493 = arith.addf %274, %492 : vector<16x32xf32>
    %cst_186 = arith.constant dense<0.000000e+00> : vector<16xf32>
    %494 = vector.multi_reduction <add>, %493, %cst_186 [1] : vector<16x32xf32> to vector<16xf32>
    %495 = vector.shape_cast %494 : vector<16xf32> to vector<16x1xf32>
    %cst_187 = arith.constant 3.200000e+01 : f32
    %496 = vector.broadcast %cst_187 : f32 to vector<16x1xf32>
    %497 = arith.divf %495, %496 : vector<16x1xf32>
    %498 = vector.broadcast %497 : vector<16x1xf32> to vector<16x32xf32>
    %499 = arith.subf %493, %498 : vector<16x32xf32>
    %500 = arith.mulf %499, %499 : vector<16x32xf32>
    %cst_188 = arith.constant dense<0.000000e+00> : vector<16xf32>
    %501 = vector.multi_reduction <add>, %500, %cst_188 [1] : vector<16x32xf32> to vector<16xf32>
    %502 = vector.shape_cast %501 : vector<16xf32> to vector<16x1xf32>
    %cst_189 = arith.constant 3.200000e+01 : f32
    %503 = vector.broadcast %cst_189 : f32 to vector<16x1xf32>
    %504 = arith.divf %502, %503 : vector<16x1xf32>
    %505 = vector.broadcast %497 : vector<16x1xf32> to vector<16x32xf32>
    %506 = arith.subf %493, %505 : vector<16x32xf32>
    %cst_190 = arith.constant 9.99999974E-6 : f32
    %507 = vector.broadcast %cst_190 : f32 to vector<16x1xf32>
    %508 = arith.addf %504, %507 : vector<16x1xf32>
    %509 = math.rsqrt %508 : vector<16x1xf32>
    %510 = vector.broadcast %509 : vector<16x1xf32> to vector<16x32xf32>
    %511 = arith.mulf %506, %510 : vector<16x32xf32>
    %512 = vector.broadcast %284 : vector<1x32xf32> to vector<16x32xf32>
    %513 = arith.mulf %511, %512 : vector<16x32xf32>
    %514 = vector.broadcast %286 : vector<1x32xf32> to vector<16x32xf32>
    %515 = arith.addf %513, %514 : vector<16x32xf32>
    %516 = arith.truncf %515 : vector<16x32xf32> to vector<16x32xbf16>
    %cst_191 = arith.constant dense<0.000000e+00> : vector<16x64xf32>
    %517 = tpu.matmul %516, %288, %cst_191 {dimension_numbers = #tpu.dot_dimension_numbers<[1], [0], [0], [1], [0, 0, 1, 1], [], []>} : vector<16x32xbf16>, vector<32x64xbf16>, vector<16x64xf32> -> vector<16x64xf32>
    %518 = vector.broadcast %290 : vector<1x64xf32> to vector<16x64xf32>
    %519 = arith.addf %517, %518 : vector<16x64xf32>
    %cst_192 = arith.constant 0.000000e+00 : f32
    %520 = vector.broadcast %cst_192 : f32 to vector<16x64xf32>
    %521 = arith.maximumf %519, %520 : vector<16x64xf32>
    %522 = arith.truncf %521 : vector<16x64xf32> to vector<16x64xbf16>
    %cst_193 = arith.constant dense<0.000000e+00> : vector<16x32xf32>
    %523 = tpu.matmul %522, %292, %cst_193 {dimension_numbers = #tpu.dot_dimension_numbers<[1], [0], [0], [1], [0, 0, 1, 1], [], []>} : vector<16x64xbf16>, vector<64x32xbf16>, vector<16x32xf32> -> vector<16x32xf32>
    %524 = vector.broadcast %294 : vector<1x32xf32> to vector<16x32xf32>
    %525 = arith.addf %523, %524 : vector<16x32xf32>
    %526 = arith.addf %515, %525 : vector<16x32xf32>
    %cst_194 = arith.constant dense<0.000000e+00> : vector<16xf32>
    %527 = vector.multi_reduction <add>, %526, %cst_194 [1] : vector<16x32xf32> to vector<16xf32>
    %528 = vector.shape_cast %527 : vector<16xf32> to vector<16x1xf32>
    %cst_195 = arith.constant 3.200000e+01 : f32
    %529 = vector.broadcast %cst_195 : f32 to vector<16x1xf32>
    %530 = arith.divf %528, %529 : vector<16x1xf32>
    %531 = vector.broadcast %530 : vector<16x1xf32> to vector<16x32xf32>
    %532 = arith.subf %526, %531 : vector<16x32xf32>
    %533 = arith.mulf %532, %532 : vector<16x32xf32>
    %cst_196 = arith.constant dense<0.000000e+00> : vector<16xf32>
    %534 = vector.multi_reduction <add>, %533, %cst_196 [1] : vector<16x32xf32> to vector<16xf32>
    %535 = vector.shape_cast %534 : vector<16xf32> to vector<16x1xf32>
    %cst_197 = arith.constant 3.200000e+01 : f32
    %536 = vector.broadcast %cst_197 : f32 to vector<16x1xf32>
    %537 = arith.divf %535, %536 : vector<16x1xf32>
    %538 = vector.broadcast %530 : vector<16x1xf32> to vector<16x32xf32>
    %539 = arith.subf %526, %538 : vector<16x32xf32>
    %cst_198 = arith.constant 9.99999974E-6 : f32
    %540 = vector.broadcast %cst_198 : f32 to vector<16x1xf32>
    %541 = arith.addf %537, %540 : vector<16x1xf32>
    %542 = math.rsqrt %541 : vector<16x1xf32>
    %543 = vector.broadcast %542 : vector<16x1xf32> to vector<16x32xf32>
    %544 = arith.mulf %539, %543 : vector<16x32xf32>
    %545 = vector.broadcast %296 : vector<1x32xf32> to vector<16x32xf32>
    %546 = arith.mulf %544, %545 : vector<16x32xf32>
    %547 = vector.broadcast %298 : vector<1x32xf32> to vector<16x32xf32>
    %548 = arith.addf %546, %547 : vector<16x32xf32>
    %c0_199 = arith.constant 0 : index
    %c0_200 = arith.constant 0 : index
    %549 = vector.load %arg13[%c0_199, %c0_200] : memref<16x32xf32, #tpu.memory_space<vmem>>, vector<16x32xf32>
    tpu.vector_store %arg13[%c0_199, %c0_200], %548 {strides = array<i32>} : memref<16x32xf32, #tpu.memory_space<vmem>>, vector<16x32xf32>,
    return
  }
}

</mosaic_0001>

<bundles_post_ra>
// kernel: tpu_custom_call.1
= control target key start
LH: loop header
LB: loop body
LE: loop exit
PB: predicated region body
PF: predicated region fallthrough
CT: control target
= control target key end

     0   :  { %18 = vsyncpa [#allocation3], 0  ;;  %s5753_s0 = inlined_call_operand.hbm [shape: f32[16,32], index: 0, kind: input, shape index: {}]   ;;  %s5754_s1 = inlined_call_operand.vmem [shape: bf16[2,32,96], index: 1, kind: input, shape index: {}]   ;;  %s5755_s2 = inlined_call_operand.vmem [shape: f32[2,1,96], index: 2, kind: input, shape index: {}]   ;;  %s5756_s3 = inlined_call_operand.vmem [shape: bf16[2,32,32], index: 3, kind: input, shape index: {}]   ;;  %s5757_s4 = inlined_call_operand.hbm [shape: f32[2,1,32], index: 4, kind: input, shape index: {}]   ;;  %s5758_s5 = inlined_call_operand.hbm [shape: f32[2,1,32], index: 5, kind: input, shape index: {}]   ;;  %s5759_s6 = inlined_call_operand.hbm [shape: f32[2,1,32], index: 6, kind: input, shape index: {}]   ;;  %s5760_s7 = inlined_call_operand.vmem [shape: bf16[2,32,64], index: 7, kind: input, shape index: {}]   ;;  %s5761_s8 = inlined_call_operand.hbm [shape: f32[2,1,64], index: 8, kind: input, shape index: {}]   ;;  %s5762_s9 = inlined_call_operand.vmem [shape: bf16[2,64,32], index: 9, kind: input, shape index: {}]   ;;  %s5763_s10 = inlined_call_operand.vmem [shape: f32[2,1,32], index: 10, kind: input, shape index: {}]   ;;  %s5764_s11 = inlined_call_operand.vmem [shape: f32[2,1,32], index: 11, kind: input, shape index: {}]   ;;  %s5765_s12 = inlined_call_operand.vmem [shape: f32[2,1,32], index: 12, kind: input, shape index: {}]   ;;  %s5766_s13 = inlined_call_operand.hbm [shape: f32[16,32], index: 13, kind: output, shape index: {}]  }
   0x1   :  { %19 = vsyncpa [#allocation6], 0 }
   0x2   :  { %20 = vsyncpa [#allocation9], 0 }
   0x3   :  { %21 = vsyncpa [#allocation4], 0  ;;  %s5011_s25 = smov [#allocation5]   ;;  %s4871_s29 = scalar_lea.hbm %s5757_s4, 32 }
   0x4   :  { %s45_s26 = sshll.u32 %s5011_s25, 4  ;;  %p4872_p0 = scmp.ne.s32.totalorder %s5757_s4, %s4871_s29  ;;  %s46_s26 = int_to_ptr.vmem [resolvable:$true] %s45_s26 }
   0x5   :  { %p4875_p1 = scmp.lt.u32.totalorder %s4871_s29, %s5757_s4 }
   0x7   :  { %p4877_p2 = pnand %p4875_p1, %p4872_p0 }
   0x9   :  { %4880 = shalt.err (!%p4877_p2)
}
   0xa   :  { %s4881_s17 = scalar_lea.vmem %s46_s26, 32  ;;  %p4886_p4 = scmp.lt.s32.totalorder %s46_s26, %s46_s26 }
   0xb   :  { %p4882_p3 = scmp.ne.s32.totalorder %s46_s26, %s4881_s17  ;;  %p4887_p5 = scmp.lt.s32.totalorder %s4881_s17, %s4881_s17 }
   0xd   :  { %p4888_p6 = por %p4887_p5, %p4886_p4 }
   0xf   :  { %p4889_p7 = pnand %p4888_p6, %p4882_p3 }
  0x11   :  { %4892 = shalt.err (!%p4889_p7)
}
  0x12   :  { %s5012_s18 = smov 16   ;;  %s5013_s19 = smov 1  }
  0x13   :  { %51 = dma.hbm_to_vmem [thread:$0]  %s5757_s4, 32, %s46_s26, [#allocation6], %s5012_s18, %s5012_s18, %s5013_s19  }
  0x14   :  { %s5014_s22 = smov [#allocation8]   ;;  %s5015_s24 = smov [#allocation2]  }
  0x15   :  { %s69_s23 = sshll.u32 %s5014_s22, 4  ;;  %s27_s25 = sshll.u32 %s5015_s24, 4  ;;  %s70_s23 = int_to_ptr.vmem [resolvable:$true] %s69_s23  ;;  %s28_s25 = int_to_ptr.vmem [resolvable:$true] %s27_s25 }
  0x16   :  { %s4893_s29 = scalar_lea.hbm %s5759_s6, 32 }
  0x17   :  { %p4894_p8 = scmp.ne.s32.totalorder %s5759_s6, %s4893_s29  ;;  %p4897_p9 = scmp.lt.u32.totalorder %s4893_s29, %s5759_s6 }
  0x19   :  { %p4899_p10 = pnand %p4897_p9, %p4894_p8 }
  0x1b   :  { %4902 = shalt.err (!%p4899_p10)
}
  0x1c   :  { %s4903_s4 = scalar_lea.vmem %s70_s23, 32  ;;  %p4908_p12 = scmp.lt.s32.totalorder %s70_s23, %s70_s23 }
  0x1d   :  { %p4904_p11 = scmp.ne.s32.totalorder %s70_s23, %s4903_s4  ;;  %p4909_p13 = scmp.lt.s32.totalorder %s4903_s4, %s4903_s4 }
  0x1f   :  { %p4910_p0 = por %p4909_p13, %p4908_p12 }
  0x21   :  { %p4911_p1 = pnand %p4910_p0, %p4904_p11 }
  0x23   :  { %4914 = shalt.err (!%p4911_p1)
}
  0x24   :  { %75 = dma.hbm_to_vmem [thread:$0]  %s5759_s6, 32, %s70_s23, [#allocation9], %s5012_s18, %s5012_s18, %s5013_s19  }
  0x25   :  { %s4915_s22 = scalar_lea.hbm %s5753_s0, 256 }
  0x26   :  { %p4916_p2 = scmp.ne.s32.totalorder %s5753_s0, %s4915_s22  ;;  %p4919_p3 = scmp.lt.u32.totalorder %s4915_s22, %s5753_s0 }
  0x28   :  { %p4921_p4 = pnand %p4919_p3, %p4916_p2 }
  0x2a   :  { %4924 = shalt.err (!%p4921_p4)
}
  0x2b   :  { %s4925_s30 = scalar_lea.vmem %s28_s25, 256  ;;  %p4930_p6 = scmp.lt.s32.totalorder %s28_s25, %s28_s25 }
  0x2c   :  { %p4926_p5 = scmp.ne.s32.totalorder %s28_s25, %s4925_s30  ;;  %p4931_p7 = scmp.lt.s32.totalorder %s4925_s30, %s4925_s30 }
  0x2e   :  { %p4932_p8 = por %p4931_p7, %p4930_p6 }
  0x30   :  { %p4933_p9 = pnand %p4932_p8, %p4926_p5 }
  0x32   :  { %4936 = shalt.err (!%p4933_p9)
}
  0x33   :  { %s5016_s6 = smov 128   ;;  %s5017_s23 = smov 8  }
  0x34   :  { %33 = dma.hbm_to_vmem [thread:$0]  %s5753_s0, 256, %s28_s25, [#allocation3], %s5016_s6, %s5016_s6, %s5017_s23  }
  0x35   :  { %s5018_s16 = smov [#allocation7]   ;;  %s5019_s26 = smov [#allocation10]  }
  0x36   :  { %s57_s4 = sshll.u32 %s5018_s16, 4  ;;  %s83_s17 = sshll.u32 %s5019_s26, 4  ;;  %s58_s4 = int_to_ptr.vmem [resolvable:$true] %s57_s4  ;;  %s84_s17 = int_to_ptr.vmem [resolvable:$true] %s83_s17 }
  0x37   :  { %s4937_s22 = scalar_lea.hbm %s5758_s5, 32 }
  0x38   :  { %p4938_p10 = scmp.ne.s32.totalorder %s5758_s5, %s4937_s22  ;;  %p4941_p11 = scmp.lt.u32.totalorder %s4937_s22, %s5758_s5 }
  0x3a   :  { %p4943_p12 = pnand %p4941_p11, %p4938_p10 }
  0x3c   :  { %4946 = shalt.err (!%p4943_p12)
}
  0x3d   :  { %s4947_s0 = scalar_lea.vmem %s58_s4, 32  ;;  %p4952_p0 = scmp.lt.s32.totalorder %s58_s4, %s58_s4 }
  0x3e   :  { %p4948_p13 = scmp.ne.s32.totalorder %s58_s4, %s4947_s0  ;;  %p4953_p1 = scmp.lt.s32.totalorder %s4947_s0, %s4947_s0 }
  0x40   :  { %p4954_p2 = por %p4953_p1, %p4952_p0 }
  0x42   :  { %p4955_p3 = pnand %p4954_p2, %p4948_p13 }
  0x44   :  { %4958 = shalt.err (!%p4955_p3)
}
  0x45   :  { %63 = dma.hbm_to_vmem [thread:$0]  %s5758_s5, 32, %s58_s4, [#allocation6], %s5012_s18, %s5012_s18, %s5013_s19  }
  0x46   :  { %s4959_s16 = scalar_lea.hbm %s5761_s8, 32 }
  0x47   :  { %p4960_p4 = scmp.ne.s32.totalorder %s5761_s8, %s4959_s16  ;;  %p4963_p5 = scmp.lt.u32.totalorder %s4959_s16, %s5761_s8 }
  0x49   :  { %p4965_p6 = pnand %p4963_p5, %p4960_p4 }
  0x4b   :  { %4968 = shalt.err (!%p4965_p6)
}
  0x4c   :  { %s4969_s24 = scalar_lea.vmem %s84_s17, 32  ;;  %p4974_p8 = scmp.lt.s32.totalorder %s84_s17, %s84_s17 }
  0x4d   :  { %p4970_p7 = scmp.ne.s32.totalorder %s84_s17, %s4969_s24  ;;  %p4975_p9 = scmp.lt.s32.totalorder %s4969_s24, %s4969_s24 }
  0x4f   :  { %p4976_p10 = por %p4975_p9, %p4974_p8 }
  0x51   :  { %p4977_p11 = pnand %p4976_p10, %p4970_p7 }
  0x53   :  { %4980 = shalt.err (!%p4977_p11)
}
  0x54   :  { %89 = dma.hbm_to_vmem [thread:$0]  %s5761_s8, 32, %s84_s17, [#allocation9], %s5012_s18, %s5012_s18, %s5013_s19  }
  0x55   :  { %5003 = dma.done.wait [#allocation3], 256  }
  0x56   :  { %5004 = vsyncadd [#allocation3], 4294967040 }
  0x57   :  { %5005 = dma.done.wait [#allocation6], 64  }
  0x58   :  { %5006 = vsyncadd [#allocation6], 4294967232 }
  0x59   :  { %5007 = dma.done.wait [#allocation9], 64  }
  0x5a   :  { %5008 = vsyncadd [#allocation9], 4294967232  ;;  %v5020_v0 = vmov 0.0   ;;  %vm5021_vm0 = vmmov 0   ;;  %v4775_v1 = vld [vmem:[%s5754_s1] sm:$0xff]   ;;  %v4776_v2 = vld [vmem:[%s5754_s1 + $0x8] sm:$0xff]  }
  0x5b   :  { %4440 = vmatprep.subr.bf16.mxu0 %v5020_v0  ;;  %4444 = vmatprep.mubr.msk.bf16.mxu0 %vm5021_vm0, %v5020_v0  ;;  %v5191_v3 = vld [vmem:[#allocation2] sm:$0xff]  ;;  %v5193_v4 = vld [vmem:[#allocation2 + $0x8] sm:$0xff]  ;;  %vm163_vm1 = vcmask 261120   ;;  %s5022_s29 = smov 64   ;;  %s5023_s0 = smov 96   ;;  %vm211_vm2 = vcmask 64512  }
  0x5c   :  { %4448 = vmatprep.subr.mxu1 %v5020_v0  ;;  %4450 = vmatprep.mubr.msk.f32.mxu1 %vm5021_vm0, %v5020_v0  ;;  %v144_v5 = vpack.c.bf16 %v5193_v4, %v5191_v3  ;;  %v4196_v6 = vld [vmem:[%s5755_s2] ss:$0 sm:$0xff]  ;;  %s5024_s25 = smov 88   ;;  %s5025_s30 = smov 120   ;;  %vm545_vm3 = vcmask 1043456   ;;  %vm2053_vm4 = vcmask 523264  }
  0x5d   :  { %4441 = vmatpush3.bf16.msra.mxu0 %v4775_v1  ;;  %s5026_s14 = smov 56   ;;  %s5027_s15 = smov 80   ;;  %v122_v40 = vld [vmem:[%s5756_s3 + $0x4] sm:$0xf]  ;;  %v121_v44 = vld [vmem:[%s5756_s3] sm:$0xf] }
  0x5e   :  { %4442 = vmatprep.subr.bf16.mxu0 %v5020_v0  ;;  %s5028_s16 = smov 112   ;;  %v5246_v41 = vsel %vm545_vm3, %v122_v40, 0  ;;  %v5255_v47 = vsel %vm545_vm3, %v121_v44, 0  ;;  %s5029_s24 = smov 48  }
  0x5f   :  { %s5030_s5 = smov 72   ;;  %s5031_s4 = smov 104  }
  0x60   :  { %s5032_s18 = smov 40  }
  0x61   :  { %4443 = vmatpush3.bf16.msra.mxu0 %v4776_v2 }
  0x62   :  { %4463 = vmatprep.subr.mxu0 %v5020_v0 }
  0x64   :  { %4445 = vmatmul.mubr.msk.bf16.vlgmr.msra.gmra.mrb[0].mxu0 %vm163_vm1, %v144_v5 }
  0x65   :  { %4465 = vmatprep.mubr.msk.f32.mxu0 %vm5021_vm0, %v5020_v0 }
 0x137   :  { %v201_v7 = vpop.f32.mrb[0].mxu0 }
 0x138   :  { %v5205_v8 = vadd.f32 %v4196_v6, %v201_v7  ;;  %v4446_v9 = vpop.f32.mrb[1].mxu0 }
 0x139   :  { %v204_v10 = vpop.f32.mrb[2].mxu0 }
 0x13a   :  { %v5207_v11 = vadd.f32 %v4196_v6, %v204_v10  ;;  %298 = vrot.lane.b32.xlu1 %v5205_v8, %s5022_s29  ;;  %209 = vrot.lane.b32.xlu0 %v5205_v8, %s5023_s0  ;;  %v4447_v12 = vpop.f32.mrb[3].mxu0 }
 0x13e   :  { %377 = vrot.lane.b32.xlu1 %v5205_v8, %s5024_s25 }
 0x1ac   :  { %v210_v13 = vpop.permute.xlu0 %209  ;;  %v299_v14 = vpop.permute.xlu1 %298 }
 0x1ad   :  { %4449 = vmatpush3.xpose.msk.msra.mxu1 %vm211_vm2, %v210_v13 }
 0x1ae   :  { %4453 = vmatprep.subr.mxu1 %v5020_v0 }
 0x1b0   :  { %4451 = vmatmul.mubr.msk.f32.vlgmr.msra.gmra.mrb[0].mxu1 %vm211_vm2, %v5205_v8  ;;  %v378_v24 = vpop.permute.xlu1 %377 }
 0x1b1   :  { %4454 = vmatpush3.msra.mxu1 %v299_v14  ;;  %4455 = vmatprep.mubr.msk.f32.mxu1 %vm5021_vm0, %v5020_v0 }
 0x1b2   :  { %4458 = vmatprep.subr.mxu1 %v5020_v0 }
 0x283   :  { %v282_v15 = vpop.f32.mrb[0].mxu1 }
 0x284   :  { %v286_v16 = vmul.f32 0.35355338, %v282_v15  ;;  %v4452_v17 = vpop.f32.mrb[1].mxu1 }
 0x286   :  { %v287_v18 = vsel %vm211_vm2, %v286_v16, -inf }
 0x287   :  { %288 = vmax.xlane.f32.xlu0 %v287_v18 }
 0x314   :  { %v289_v19 = vpop.xlane.xlu0 %288 }
 0x315   :  { %v290_v20 = vsub.f32 %v286_v16, %v289_v19  ;;  %v123_v19 = vld [vmem:[%s5756_s3 + $0x8] sm:$0xf] }
 0x317   :  { %v291_v21 = vmul.f32 1.442695, %v290_v20  ;;  %v5296_v20 = vsel %vm545_vm3, %v123_v19, 0 }
 0x319   :  { %4791 = vpow2.f32 %v291_v21 }
 0x323   :  { %v4792_v22 = vpop.eup %4791 }
 0x324   :  { %v293_v23 = vsel %vm211_vm2, %v4792_v22, 0.0 }
 0x325   :  { %294 = vadd.xlane.f32.xlu1 %v293_v23 }
 0x336   :  { %375 = vrot.lane.b32.xlu1 %v5205_v8, %s5025_s30 }
 0x3b2   :  { %v295_v25 = vpop.xlane.xlu1 %294 }
 0x3b3   :  { %4793 = vrcp.f32 %v295_v25 }
 0x3b6   :  { %v376_v28 = vpop.permute.xlu1 %375 }
 0x3bd   :  { %v4794_v26 = vpop.eup %4793 }
 0x3be   :  { %v297_v27 = vmul.f32 %v4794_v26, %v4792_v22 }
 0x3c0   :  { %4456 = vmatmul.mubr.msk.f32.vlgmr.msra.gmra.mrb[2].mxu1 %vm211_vm2, %v297_v27 }
 0x3c1   :  { %4459 = vmatpush3.xpose.msk.msra.mxu1 %vm211_vm2, %v378_v24  ;;  %4460 = vmatprep.mubr.msk.f32.mxu1 %vm5021_vm0, %v5020_v0 }
 0x3c2   :  { %4468 = vmatprep.subr.bf16.mxu1 %v5020_v0 }
 0x3c4   :  { %4461 = vmatmul.mubr.msk.f32.vlgmr.msra.gmra.mrb[4].mxu1 %vm211_vm2, %v376_v28 }
 0x3c5   :  { %4470 = vmatprep.mubr.msk.bf16.mxu1 %vm5021_vm0, %v5020_v0  ;;  %4469 = vmatpush3.bf16.msra.mxu1 %v5246_v41 }
 0x3c6   :  { %4480 = vmatprep.subr.mxu1 %v5020_v0 }
 0x493   :  { %v370_v29 = vpop.f32.mrb[2].mxu1 }
 0x494   :  { %v4457_v30 = vpop.f32.mrb[3].mxu1  ;;  %v374_v48 = vpack.c.bf16 %v370_v29, %v370_v29 }
 0x497   :  { %v449_v31 = vpop.f32.mrb[4].mxu1 }
 0x498   :  { %v453_v32 = vmul.f32 0.35355338, %v449_v31  ;;  %v4462_v33 = vpop.f32.mrb[5].mxu1 }
 0x499   :  { %v124_v33 = vld [vmem:[%s5756_s3 + $0xc] sm:$0xf] }
 0x49a   :  { %v454_v34 = vsel %vm211_vm2, %v453_v32, -inf }
 0x49b   :  { %455 = vmax.xlane.f32.xlu1 %v454_v34  ;;  %v5317_v34 = vsel %vm545_vm3, %v124_v33, 0 }
 0x528   :  { %v456_v35 = vpop.xlane.xlu1 %455 }
 0x529   :  { %v457_v36 = vsub.f32 %v453_v32, %v456_v35 }
 0x52b   :  { %v458_v37 = vmul.f32 1.442695, %v457_v36 }
 0x52d   :  { %4795 = vpow2.f32 %v458_v37 }
 0x537   :  { %v4796_v38 = vpop.eup %4795 }
 0x538   :  { %v460_v39 = vsel %vm211_vm2, %v4796_v38, 0.0 }
 0x539   :  { %461 = vadd.xlane.f32.xlu0 %v460_v39 }
 0x54f   :  { %465 = vrot.lane.b32.xlu0 %v5205_v8, %s5026_s14 }
 0x553   :  { %637 = vrot.lane.b32.xlu0 %v5205_v8, %s5027_s15 }
 0x557   :  { %635 = vrot.lane.b32.xlu0 %v5205_v8, %s5028_s16 }
 0x5c6   :  { %v462_v42 = vpop.xlane.xlu0 %461 }
 0x5c7   :  { %4797 = vrcp.f32 %v462_v42 }
 0x5ca   :  { %v466_v43 = vpop.permute.xlu0 %465 }
 0x5cb   :  { %4464 = vmatpush3.msra.mxu0 %v466_v43 }
 0x5cc   :  { %4474 = vmatprep.subr.bf16.mxu0 %v5020_v0 }
 0x5ce   :  { %v638_v52 = vpop.permute.xlu0 %637 }
 0x5d1   :  { %v4798_v45 = vpop.eup %4797 }
 0x5d2   :  { %v464_v46 = vmul.f32 %v4798_v45, %v4796_v38  ;;  %v636_v57 = vpop.permute.xlu0 %635 }
 0x5d4   :  { %4466 = vmatmul.mubr.msk.f32.vlgmr.msra.gmra.mrb[4].mxu0 %vm211_vm2, %v464_v46 }
 0x5d5   :  { %4475 = vmatpush3.bf16.msra.mxu0 %v5255_v47  ;;  %4476 = vmatprep.mubr.msk.bf16.mxu0 %vm5021_vm0, %v5020_v0 }
 0x5d6   :  { %4485 = vmatprep.subr.mxu0 %v5020_v0 }
 0x5d8   :  { %4477 = vmatmul.mubr.msk.bf16.vlgmr.msra.gmra.mrb[8].mxu0 %vm211_vm2, %v374_v48 }
 0x5d9   :  { %4487 = vmatprep.mubr.msk.f32.mxu0 %vm5021_vm0, %v5020_v0 }
 0x6a7   :  { %v537_v49 = vpop.f32.mrb[4].mxu0 }
 0x6a8   :  { %v541_v50 = vpack.c.bf16 %v537_v49, %v537_v49  ;;  %v4467_v51 = vpop.f32.mrb[5].mxu0 }
 0x6aa   :  { %4471 = vmatmul.mubr.msk.bf16.vlgmr.msra.gmra.mrb[8].mxu1 %vm211_vm2, %v541_v50 }
 0x6ab   :  { %4481 = vmatpush3.xpose.msk.msra.mxu1 %vm211_vm2, %v638_v52  ;;  %v629_v53 = vpop.f32.mrb[8].mxu0  ;;  %4482 = vmatprep.mubr.msk.f32.mxu1 %vm5021_vm0, %v5020_v0 }
 0x6ac   :  { %v4478_v54 = vpop.f32.mrb[9].mxu0  ;;  %4490 = vmatprep.subr.bf16.mxu1 %v5020_v0 }
 0x6ad   :  { %v632_v55 = vpop.f32.mrb[10].mxu0 }
 0x6ae   :  { %v4479_v56 = vpop.f32.mrb[11].mxu0 }
 0x6b2   :  { %4483 = vmatmul.mubr.msk.f32.vlgmr.msra.gmra.mrb[6].mxu1 %vm211_vm2, %v636_v57 }
 0x6b3   :  { %4492 = vmatprep.mubr.msk.bf16.mxu1 %vm5021_vm0, %v5020_v0  ;;  %4491 = vmatpush3.bf16.msra.mxu1 %v5296_v20 }
 0x6b4   :  { %4506 = vmatprep.subr.bf16.mxu1 %v5020_v0 }
 0x77d   :  { %v583_v58 = vpop.f32.mrb[8].mxu1 }
 0x77e   :  { %v5273_v59 = vadd.f32 %v629_v53, %v583_v58  ;;  %v4472_v60 = vpop.f32.mrb[9].mxu1 }
 0x77f   :  { %v586_v61 = vpop.f32.mrb[10].mxu1 }
 0x780   :  { %v4473_v62 = vpop.f32.mrb[11].mxu1 }
 0x785   :  { %v709_v63 = vpop.f32.mrb[6].mxu1 }
 0x786   :  { %v713_v1 = vmul.f32 0.35355338, %v709_v63  ;;  %v4484_v2 = vpop.f32.mrb[7].mxu1 }
 0x788   :  { %v714_v5 = vsel %vm211_vm2, %v713_v1, -inf }
 0x789   :  { %715 = vmax.xlane.f32.xlu1 %v714_v5 }
 0x79a   :  { %725 = vrot.lane.b32.xlu1 %v5205_v8, %s5029_s24 }
 0x79e   :  { %851 = vrot.lane.b32.xlu1 %v5205_v8, %s5030_s5 }
 0x7a2   :  { %849 = vrot.lane.b32.xlu1 %v5205_v8, %s5031_s4 }
 0x816   :  { %v716_v6 = vpop.xlane.xlu1 %715 }
 0x817   :  { %v717_v7 = vsub.f32 %v713_v1, %v716_v6 }
 0x819   :  { %v718_v9 = vmul.f32 1.442695, %v717_v7 }
 0x81a   :  { %v726_v10 = vpop.permute.xlu1 %725 }
 0x81b   :  { %4799 = vpow2.f32 %v718_v9  ;;  %4486 = vmatpush3.msra.mxu0 %v726_v10 }
 0x81c   :  { %4496 = vmatprep.subr.mxu0 %v5020_v0 }
 0x81e   :  { %v852_v16 = vpop.permute.xlu1 %851 }
 0x822   :  { %v850_v18 = vpop.permute.xlu1 %849 }
 0x825   :  { %v4800_v12 = vpop.eup %4799 }
 0x826   :  { %v720_v13 = vsel %vm211_vm2, %v4800_v12, 0.0 }
 0x827   :  { %721 = vadd.xlane.f32.xlu0 %v720_v13 }
 0x8b4   :  { %v722_v14 = vpop.xlane.xlu0 %721 }
 0x8b5   :  { %4801 = vrcp.f32 %v722_v14 }
 0x8bf   :  { %v4802_v15 = vpop.eup %4801 }
 0x8c0   :  { %v724_v17 = vmul.f32 %v4802_v15, %v4800_v12 }
 0x8c2   :  { %4488 = vmatmul.mubr.msk.f32.vlgmr.msra.gmra.mrb[6].mxu0 %vm211_vm2, %v724_v17 }
 0x8c3   :  { %4497 = vmatpush3.xpose.msk.msra.mxu0 %vm211_vm2, %v852_v16  ;;  %4498 = vmatprep.mubr.msk.f32.mxu0 %vm5021_vm0, %v5020_v0 }
 0x8c4   :  { %4501 = vmatprep.subr.mxu0 %v5020_v0 }
 0x8c6   :  { %4499 = vmatmul.mubr.msk.f32.vlgmr.msra.gmra.mrb[12].mxu0 %vm211_vm2, %v850_v18 }
 0x8c7   :  { %4503 = vmatprep.mubr.msk.f32.mxu0 %vm5021_vm0, %v5020_v0 }
 0x995   :  { %v797_v21 = vpop.f32.mrb[6].mxu0 }
 0x996   :  { %v801_v22 = vpack.c.bf16 %v797_v21, %v797_v21  ;;  %v4489_v23 = vpop.f32.mrb[7].mxu0 }
 0x998   :  { %4493 = vmatmul.mubr.msk.bf16.vlgmr.msra.gmra.mrb[12].mxu1 %vm211_vm2, %v801_v22 }
 0x999   :  { %v923_v24 = vpop.f32.mrb[12].mxu0  ;;  %4508 = vmatprep.mubr.msk.bf16.mxu1 %vm5021_vm0, %v5020_v0  ;;  %4507 = vmatpush3.bf16.msra.mxu1 %v5317_v34 }
 0x99a   :  { %v927_v25 = vmul.f32 0.35355338, %v923_v24  ;;  %v4500_v26 = vpop.f32.mrb[13].mxu0  ;;  %4522 = vmatprep.subr.mxu1 %v5020_v0 }
 0x99c   :  { %v928_v27 = vsel %vm211_vm2, %v927_v25, -inf }
 0x99d   :  { %929 = vmax.xlane.f32.xlu1 %v928_v27 }
 0x9ae   :  { %1229 = vrot.lane.b32.xlu1 %v5207_v11, %s5025_s30 }
 0xa2a   :  { %v930_v28 = vpop.xlane.xlu1 %929 }
 0xa2b   :  { %v931_v29 = vsub.f32 %v927_v25, %v930_v28 }
 0xa2d   :  { %v932_v30 = vmul.f32 1.442695, %v931_v29 }
 0xa2e   :  { %v1230_v54 = vpop.permute.xlu1 %1229 }
 0xa2f   :  { %4803 = vpow2.f32 %v932_v30 }
 0xa39   :  { %v4804_v31 = vpop.eup %4803 }
 0xa3a   :  { %v934_v32 = vsel %vm211_vm2, %v4804_v31, 0.0 }
 0xa3b   :  { %935 = vadd.xlane.f32.xlu0 %v934_v32 }
 0xa51   :  { %939 = vrot.lane.b32.xlu0 %v5205_v8, %s5032_s18 }
 0xa55   :  { %1064 = vrot.lane.b32.xlu0 %v5207_v11, %s5023_s0 }
 0xa59   :  { %1231 = vrot.lane.b32.xlu0 %v5207_v11, %s5024_s25 }
 0xa6b   :  { %v842_v35 = vpop.f32.mrb[12].mxu1 }
 0xa6c   :  { %v848_v8 = vadd.f32 %v842_v35, %v5273_v59  ;;  %v4494_v36 = vpop.f32.mrb[13].mxu1 }
 0xa6d   :  { %v845_v37 = vpop.f32.mrb[14].mxu1 }
 0xa6e   :  { %v4495_v38 = vpop.f32.mrb[15].mxu1 }
 0xac8   :  { %v936_v39 = vpop.xlane.xlu0 %935 }
 0xac9   :  { %4805 = vrcp.f32 %v936_v39 }
 0xacc   :  { %v940_v40 = vpop.permute.xlu0 %939 }
 0xacd   :  { %4502 = vmatpush3.msra.mxu0 %v940_v40 }
 0xace   :  { %4512 = vmatprep.subr.mxu0 %v5020_v0 }
 0xad0   :  { %v1065_v44 = vpop.permute.xlu0 %1064 }
 0xad3   :  { %v4806_v42 = vpop.eup %4805 }
 0xad4   :  { %v938_v43 = vmul.f32 %v4806_v42, %v4804_v31  ;;  %v1232_v49 = vpop.permute.xlu0 %1231 }
 0xad6   :  { %4504 = vmatmul.mubr.msk.f32.vlgmr.msra.gmra.mrb[14].mxu0 %vm211_vm2, %v938_v43 }
 0xad7   :  { %4513 = vmatpush3.xpose.msk.msra.mxu0 %vm211_vm2, %v1065_v44  ;;  %4514 = vmatprep.mubr.msk.f32.mxu0 %vm5021_vm0, %v5020_v0 }
 0xad8   :  { %4517 = vmatprep.subr.mxu0 %v5020_v0 }
 0xada   :  { %4515 = vmatmul.mubr.msk.f32.vlgmr.msra.gmra.mrb[16].mxu0 %vm211_vm2, %v5207_v11 }
 0xadb   :  { %4519 = vmatprep.mubr.msk.f32.mxu0 %vm5021_vm0, %v5020_v0 }
 0xba9   :  { %v1011_v45 = vpop.f32.mrb[14].mxu0 }
 0xbaa   :  { %v1015_v46 = vpack.c.bf16 %v1011_v45, %v1011_v45  ;;  %v4505_v48 = vpop.f32.mrb[15].mxu0 }
 0xbac   :  { %4509 = vmatmul.mubr.msk.bf16.vlgmr.msra.gmra.mrb[16].mxu1 %vm211_vm2, %v1015_v46 }
 0xbad   :  { %4523 = vmatpush3.xpose.msk.msra.mxu1 %vm211_vm2, %v1232_v49  ;;  %v1136_v50 = vpop.f32.mrb[16].mxu0  ;;  %4524 = vmatprep.mubr.msk.f32.mxu1 %vm5021_vm0, %v5020_v0 }
 0xbae   :  { %v1140_v51 = vmul.f32 0.35355338, %v1136_v50  ;;  %v4516_v52 = vpop.f32.mrb[17].mxu0  ;;  %4532 = vmatprep.subr.bf16.mxu1 %v5020_v0 }
 0xbb0   :  { %v1141_v53 = vsel %vm211_vm2, %v1140_v51, -inf }
 0xbb1   :  { %1142 = vmax.xlane.f32.xlu0 %v1141_v53 }
 0xbb4   :  { %4525 = vmatmul.mubr.msk.f32.vlgmr.msra.gmra.mrb[20].mxu1 %vm211_vm2, %v1230_v54 }
 0xbb5   :  { %4533 = vmatpush3.bf16.msra.mxu1 %v5246_v41  ;;  %4534 = vmatprep.mubr.msk.bf16.mxu1 %vm5021_vm0, %v5020_v0 }
 0xbb6   :  { %4544 = vmatprep.subr.mxu1 %v5020_v0 }
 0xc3e   :  { %v1143_v55 = vpop.xlane.xlu0 %1142 }
 0xc3f   :  { %v1144_v56 = vsub.f32 %v1140_v51, %v1143_v55 }
 0xc41   :  { %v1145_v57 = vmul.f32 1.442695, %v1144_v56 }
 0xc43   :  { %4807 = vpow2.f32 %v1145_v57 }
 0xc4d   :  { %v4808_v58 = vpop.eup %4807 }
 0xc4e   :  { %v1147_v59 = vsel %vm211_vm2, %v4808_v58, 0.0 }
 0xc4f   :  { %1148 = vadd.xlane.f32.xlu0 %v1147_v59 }
 0xc7f   :  { %v1056_v60 = vpop.f32.mrb[16].mxu1 }
 0xc80   :  { %v5344_v61 = vadd.f32 %v1056_v60, %v848_v8  ;;  %v4510_v62 = vpop.f32.mrb[17].mxu1 }
 0xc81   :  { %v1059_v63 = vpop.f32.mrb[18].mxu1 }
 0xc82   :  { %v4511_v1 = vpop.f32.mrb[19].mxu1 }
 0xc87   :  { %v1303_v41 = vpop.f32.mrb[20].mxu1 }
 0xc88   :  { %v1307_v2 = vmul.f32 0.35355338, %v1303_v41  ;;  %v4526_v5 = vpop.f32.mrb[21].mxu1 }
 0xc8a   :  { %v1308_v6 = vsel %vm211_vm2, %v1307_v2, -inf }
 0xc8b   :  { %1309 = vmax.xlane.f32.xlu1 %v1308_v6 }
 0xc9c   :  { %1319 = vrot.lane.b32.xlu1 %v5207_v11, %s5026_s14 }
 0xcdc   :  { %v1149_v14 = vpop.xlane.xlu0 %1148 }
 0xd18   :  { %v1310_v7 = vpop.xlane.xlu1 %1309 }
 0xd19   :  { %v1311_v9 = vsub.f32 %v1307_v2, %v1310_v7 }
 0xd1b   :  { %v1312_v10 = vmul.f32 1.442695, %v1311_v9 }
 0xd1c   :  { %v1320_v19 = vpop.permute.xlu1 %1319 }
 0xd1d   :  { %4809 = vpow2.f32 %v1312_v10 }
 0xd1e   :  { %4811 = vrcp.f32 %v1149_v14 }
 0xd27   :  { %v4810_v12 = vpop.eup %4809 }
 0xd28   :  { %v1314_v13 = vsel %vm211_vm2, %v4810_v12, 0.0  ;;  %v4812_v16 = vpop.eup %4811 }
 0xd29   :  { %1315 = vadd.xlane.f32.xlu0 %v1314_v13  ;;  %v1151_v17 = vmul.f32 %v4812_v16, %v4808_v58 }
 0xd3f   :  { %1152 = vrot.lane.b32.xlu0 %v5207_v11, %s5022_s29 }
 0xd43   :  { %1484 = vrot.lane.b32.xlu0 %v5207_v11, %s5027_s15 }
 0xd47   :  { %1482 = vrot.lane.b32.xlu0 %v5207_v11, %s5028_s16 }
 0xdb6   :  { %v1316_v15 = vpop.xlane.xlu0 %1315 }
 0xdb7   :  { %4813 = vrcp.f32 %v1316_v15 }
 0xdba   :  { %v1153_v18 = vpop.permute.xlu0 %1152 }
 0xdbb   :  { %4518 = vmatpush3.msra.mxu0 %v1153_v18 }
 0xdbc   :  { %4520 = vmatmul.mubr.msk.f32.vlgmr.msra.gmra.mrb[18].mxu0 %vm211_vm2, %v1151_v17  ;;  %4527 = vmatprep.subr.mxu0 %v5020_v0 }
 0xdbd   :  { %4528 = vmatpush3.msra.mxu0 %v1320_v19  ;;  %4529 = vmatprep.mubr.msk.f32.mxu0 %vm5021_vm0, %v5020_v0 }
 0xdbe   :  { %4538 = vmatprep.subr.bf16.mxu0 %v5020_v0  ;;  %v1485_v29 = vpop.permute.xlu0 %1484 }
 0xdc1   :  { %v4814_v21 = vpop.eup %4813 }
 0xdc2   :  { %v1318_v22 = vmul.f32 %v4814_v21, %v4810_v12 }
 0xdc4   :  { %4530 = vmatmul.mubr.msk.f32.vlgmr.msra.gmra.mrb[20].mxu0 %vm211_vm2, %v1318_v22 }
 0xdc5   :  { %4539 = vmatpush3.bf16.msra.mxu0 %v5255_v47  ;;  %4540 = vmatprep.mubr.msk.bf16.mxu0 %vm5021_vm0, %v5020_v0  ;;  %v1483_v47 = vpop.permute.xlu0 %1482 }
 0xdc6   :  { %4549 = vmatprep.subr.mxu0 %v5020_v0 }
 0xe8f   :  { %v1224_v23 = vpop.f32.mrb[18].mxu0 }
 0xe90   :  { %v1228_v24 = vpack.c.bf16 %v1224_v23, %v1224_v23  ;;  %v4521_v25 = vpop.f32.mrb[19].mxu0 }
 0xe92   :  { %4541 = vmatmul.mubr.msk.bf16.vlgmr.msra.gmra.mrb[24].mxu0 %vm211_vm2, %v1228_v24 }
 0xe93   :  { %4551 = vmatprep.mubr.msk.f32.mxu0 %vm5021_vm0, %v5020_v0 }
 0xe97   :  { %v1391_v26 = vpop.f32.mrb[20].mxu0 }
 0xe98   :  { %v1395_v27 = vpack.c.bf16 %v1391_v26, %v1391_v26  ;;  %v4531_v28 = vpop.f32.mrb[21].mxu0 }
 0xe9a   :  { %4535 = vmatmul.mubr.msk.bf16.vlgmr.msra.gmra.mrb[24].mxu1 %vm211_vm2, %v1395_v27 }
 0xe9b   :  { %4545 = vmatpush3.xpose.msk.msra.mxu1 %vm211_vm2, %v1485_v29  ;;  %4546 = vmatprep.mubr.msk.f32.mxu1 %vm5021_vm0, %v5020_v0 }
 0xe9c   :  { %4554 = vmatprep.subr.bf16.mxu1 %v5020_v0 }
 0xea2   :  { %4547 = vmatmul.mubr.msk.f32.vlgmr.msra.gmra.mrb[22].mxu1 %vm211_vm2, %v1483_v47 }
 0xea3   :  { %4555 = vmatpush3.bf16.msra.mxu1 %v5296_v20  ;;  %4556 = vmatprep.mubr.msk.bf16.mxu1 %vm5021_vm0, %v5020_v0 }
 0xea4   :  { %4570 = vmatprep.subr.bf16.mxu1 %v5020_v0 }
 0xf65   :  { %v1476_v30 = vpop.f32.mrb[24].mxu0 }
 0xf66   :  { %v4542_v31 = vpop.f32.mrb[25].mxu0 }
 0xf67   :  { %v1479_v32 = vpop.f32.mrb[26].mxu0 }
 0xf68   :  { %v4543_v33 = vpop.f32.mrb[27].mxu0 }
 0xf6d   :  { %v1433_v35 = vpop.f32.mrb[24].mxu1 }
 0xf6e   :  { %v5379_v8 = vadd.f32 %v1476_v30, %v1433_v35  ;;  %v4536_v36 = vpop.f32.mrb[25].mxu1 }
 0xf6f   :  { %v1436_v37 = vpop.f32.mrb[26].mxu1 }
 0xf70   :  { %v4537_v38 = vpop.f32.mrb[27].mxu1 }
 0xf71   :  { %v4777_v38 = vld [vmem:[%s5760_s7] sm:$0xff]  }
 0xf75   :  { %v1556_v39 = vpop.f32.mrb[22].mxu1 }
 0xf76   :  { %v1560_v40 = vmul.f32 0.35355338, %v1556_v39  ;;  %v4548_v42 = vpop.f32.mrb[23].mxu1  ;;  %v4779_v39 = vld [vmem:[%s5762_s9] sm:$0xff]  }
 0xf78   :  { %v1561_v20 = vsel %vm211_vm2, %v1560_v40, -inf }
 0xf79   :  { %1562 = vmax.xlane.f32.xlu1 %v1561_v20 }
 0xf8a   :  { %1695 = vrot.lane.b32.xlu1 %v5207_v11, %s5030_s5 }
 0xf8e   :  { %1693 = vrot.lane.b32.xlu1 %v5207_v11, %s5031_s4 }
0x1006   :  { %v1563_v43 = vpop.xlane.xlu1 %1562 }
0x1007   :  { %v1564_v44 = vsub.f32 %v1560_v40, %v1563_v43  ;;  %v4780_v40 = vld [vmem:[%s5762_s9 + $0x8] sm:$0xff]  }
0x1009   :  { %v1565_v45 = vmul.f32 1.442695, %v1564_v44 }
0x100a   :  { %v1696_v52 = vpop.permute.xlu1 %1695 }
0x100b   :  { %4815 = vpow2.f32 %v1565_v45 }
0x100e   :  { %v1694_v54 = vpop.permute.xlu1 %1693 }
0x1015   :  { %v4816_v46 = vpop.eup %4815 }
0x1016   :  { %v1567_v48 = vsel %vm211_vm2, %v4816_v46, 0.0 }
0x1017   :  { %1568 = vadd.xlane.f32.xlu0 %v1567_v48 }
0x102d   :  { %1572 = vrot.lane.b32.xlu0 %v5207_v11, %s5029_s24 }
0x10a4   :  { %v1569_v49 = vpop.xlane.xlu0 %1568 }
0x10a5   :  { %4817 = vrcp.f32 %v1569_v49 }
0x10a8   :  { %v1573_v50 = vpop.permute.xlu0 %1572 }
0x10a9   :  { %4550 = vmatpush3.msra.mxu0 %v1573_v50  ;;  %v4233_v50 = vld [vmem:[#allocation7] ss:$0 sm:$0xff] }
0x10aa   :  { %4560 = vmatprep.subr.mxu0 %v5020_v0 }
0x10af   :  { %v4818_v51 = vpop.eup %4817 }
0x10b0   :  { %v1571_v53 = vmul.f32 %v4818_v51, %v4816_v46 }
0x10b2   :  { %4552 = vmatmul.mubr.msk.f32.vlgmr.msra.gmra.mrb[22].mxu0 %vm211_vm2, %v1571_v53 }
0x10b3   :  { %4561 = vmatpush3.xpose.msk.msra.mxu0 %vm211_vm2, %v1696_v52  ;;  %4562 = vmatprep.mubr.msk.f32.mxu0 %vm5021_vm0, %v5020_v0 }
0x10b4   :  { %4565 = vmatprep.subr.mxu0 %v5020_v0 }
0x10b6   :  { %4563 = vmatmul.mubr.msk.f32.vlgmr.msra.gmra.mrb[28].mxu0 %vm211_vm2, %v1694_v54  ;;  %v4234_v54 = vld [vmem:[#allocation8] ss:$0 sm:$0xff] }
0x10b7   :  { %4567 = vmatprep.mubr.msk.f32.mxu0 %vm5021_vm0, %v5020_v0 }
0x1185   :  { %v1644_v55 = vpop.f32.mrb[22].mxu0 }
0x1186   :  { %v1648_v56 = vpack.c.bf16 %v1644_v55, %v1644_v55  ;;  %v4553_v57 = vpop.f32.mrb[23].mxu0 }
0x1188   :  { %4557 = vmatmul.mubr.msk.bf16.vlgmr.msra.gmra.mrb[28].mxu1 %vm211_vm2, %v1648_v56 }
0x1189   :  { %v1767_v58 = vpop.f32.mrb[28].mxu0  ;;  %4571 = vmatpush3.bf16.msra.mxu1 %v5317_v34  ;;  %4572 = vmatprep.mubr.msk.bf16.mxu1 %vm5021_vm0, %v5020_v0  ;;  %v4232_v34 = vld [vmem:[#allocation5] ss:$0 sm:$0xff] }
0x118a   :  { %v1771_v59 = vmul.f32 0.35355338, %v1767_v58  ;;  %v4564_v60 = vpop.f32.mrb[29].mxu0  ;;  %4584 = vmatprep.subr.bf16.mxu1 %v5020_v0  ;;  %v1910_v5 = vadd.f32 %v4232_v34, %v5344_v61 }
0x118b   :  { %v4782_v60 = vld [vmem:[%s5762_s9 + $0x18] sm:$0xff]  }
0x118c   :  { %v1772_v62 = vsel %vm211_vm2, %v1771_v59, -inf  ;;  %v1912_v9 = vadd.f32 %v1910_v5, %v5191_v3 }
0x118d   :  { %1773 = vmax.xlane.f32.xlu0 %v1772_v62  ;;  %v4235_v62 = vld [vmem:[#allocation10] ss:$0 sm:$0xff] }
0x118e   :  { %v1914_v10 = vsel %vm163_vm1, %v1912_v9, 0.0 }
0x11a3   :  { %1783 = vrot.lane.b32.xlu0 %v5207_v11, %s5032_s18 }
0x121a   :  { %v1774_v63 = vpop.xlane.xlu0 %1773 }
0x121b   :  { %v1775_v1 = vsub.f32 %v1771_v59, %v1774_v63  ;;  %v4781_v59 = vld [vmem:[%s5762_s9 + $0x10] sm:$0xff]  }
0x121d   :  { %v1776_v41 = vmul.f32 1.442695, %v1775_v1 }
0x121e   :  { %v1784_v2 = vpop.permute.xlu0 %1783 }
0x121f   :  { %4819 = vpow2.f32 %v1776_v41  ;;  %4566 = vmatpush3.msra.mxu0 %v1784_v2 }
0x1220   :  { %4576 = vmatprep.subr.bf16.mxu0 %v5020_v0 }
0x1229   :  { %v4820_v6 = vpop.eup %4819 }
0x122a   :  { %v1778_v7 = vsel %vm211_vm2, %v4820_v6, 0.0 }
0x122b   :  { %1779 = vadd.xlane.f32.xlu1 %v1778_v7 }
0x122f   :  { %1915 = vadd.xlane.f32.xlu1 %v1914_v10  ;;  %v4239_v10 = vld [vmem:[%s5763_s10] ss:$0 sm:$0xff] }
0x125b   :  { %v1686_v11 = vpop.f32.mrb[28].mxu1 }
0x125c   :  { %v1692_v12 = vadd.f32 %v1686_v11, %v5379_v8  ;;  %v4558_v13 = vpop.f32.mrb[29].mxu1 }
0x125d   :  { %v1689_v14 = vpop.f32.mrb[30].mxu1 }
0x125e   :  { %v4559_v15 = vpop.f32.mrb[31].mxu1 }
0x12b8   :  { %v1780_v16 = vpop.xlane.xlu1 %1779 }
0x12b9   :  { %4821 = vrcp.f32 %v1780_v16 }
0x12bc   :  { %v1916_v21 = vpop.xlane.xlu1 %1915 }
0x12bd   :  { %v1921_v22 = vmul.f32 0.03125, %v1916_v21 }
0x12bf   :  { %v1923_v27 = vsub.f32 %v1912_v9, %v1921_v22 }
0x12c1   :  { %v1925_v31 = vmul.f32 %v1923_v27, %v1923_v27 }
0x12c3   :  { %v4822_v17 = vpop.eup %4821  ;;  %v1927_v32 = vsel %vm163_vm1, %v1925_v31, 0.0 }
0x12c4   :  { %v1782_v18 = vmul.f32 %v4822_v17, %v4820_v6 }
0x12c6   :  { %4568 = vmatmul.mubr.msk.f32.vlgmr.msra.gmra.mrb[30].mxu0 %vm211_vm2, %v1782_v18 }
0x12c7   :  { %4580 = vmatprep.mubr.msk.bf16.mxu0 %vm5021_vm0, %v5020_v0  ;;  %4577 = vmatpush3.bf16.msra.mxu0 %v4777_v38 }
0x12c8   :  { %4578 = vmatprep.subr.bf16.mxu0 %v5020_v0 }
0x1399   :  { %v1855_v3 = vpop.f32.mrb[30].mxu0 }
0x139a   :  { %v1859_v61 = vpack.c.bf16 %v1855_v3, %v1855_v3  ;;  %v4569_v19 = vpop.f32.mrb[31].mxu0 }
0x139c   :  { %4573 = vmatmul.mubr.msk.bf16.vlgmr.msra.gmra.mrb[32].mxu1 %vm211_vm2, %v1859_v61 }
0x139d   :  { %4592 = vmatprep.mubr.msk.bf16.mxu1 %vm5021_vm0, %v5020_v0  ;;  %4585 = vmatpush3.bf16.msra.mxu1 %v4779_v39 }
0x139e   :  { %4586 = vmatprep.subr.bf16.mxu1 %v5020_v0 }
0x13a1   :  { %4587 = vmatpush3.bf16.msra.mxu1 %v4780_v40 }
0x13a2   :  { %4588 = vmatprep.subr.bf16.mxu1 %v5020_v0 }
0x13a5   :  { %4589 = vmatpush3.bf16.msra.mxu1 %v4781_v59 }
0x13a6   :  { %4590 = vmatprep.subr.bf16.mxu1 %v5020_v0 }
0x13a9   :  { %4591 = vmatpush3.bf16.msra.mxu1 %v4782_v60 }
0x13aa   :  { %4609 = vmatprep.subr.mxu1 %v5020_v0 }
0x146f   :  { %v1897_v23 = vpop.f32.mrb[32].mxu1 }
0x1470   :  { %v1903_v24 = vadd.f32 %v1897_v23, %v1692_v12  ;;  %v4574_v25 = vpop.f32.mrb[33].mxu1 }
0x1471   :  { %v1900_v26 = vpop.f32.mrb[34].mxu1 }
0x1472   :  { %v1911_v28 = vadd.f32 %v4232_v34, %v1903_v24  ;;  %v4575_v29 = vpop.f32.mrb[35].mxu1 }
0x1474   :  { %v1913_v47 = vadd.f32 %v1911_v28, %v5193_v4  ;;  %v4778_v4 = vld [vmem:[%s5760_s7 + $0x8] sm:$0xff]  }
0x1475   :  { %4579 = vmatpush3.bf16.msra.mxu0 %v4778_v4  ;;  %v4245_v4 = vld [vmem:[%s5764_s11] ss:$0 sm:$0xff] }
0x1476   :  { %v1917_v30 = vsel %vm163_vm1, %v1913_v47, 0.0  ;;  %4596 = vmatprep.subr.bf16.mxu0 %v5020_v0 }
0x1477   :  { %1918 = vadd.xlane.f32.xlu1 %v1917_v30  ;;  %v4784_v30 = vld [vmem:[%s5754_s1 + $0x18] sm:$0xff]  }
0x147b   :  { %1928 = vadd.xlane.f32.xlu1 %v1927_v32 }
0x1504   :  { %v1919_v33 = vpop.xlane.xlu1 %1918 }
0x1505   :  { %v1922_v35 = vmul.f32 0.03125, %v1919_v33 }
0x1507   :  { %v1924_v8 = vsub.f32 %v1913_v47, %v1922_v35  ;;  %v4783_v47 = vld [vmem:[%s5754_s1 + $0x10] sm:$0xff]  }
0x1508   :  { %v1929_v42 = vpop.xlane.xlu1 %1928 }
0x1509   :  { %v1926_v36 = vmul.f32 %v1924_v8, %v1924_v8  ;;  %v1933_v20 = vmul.f32 0.03125, %v1929_v42 }
0x150b   :  { %v1930_v37 = vsel %vm163_vm1, %v1926_v36, 0.0  ;;  %v1935_v43 = vadd.f32 1e-05, %v1933_v20  ;;  %v4246_v20 = vld [vmem:[%s5765_s12] ss:$0 sm:$0xff] }
0x150c   :  { %1931 = vadd.xlane.f32.xlu1 %v1930_v37 }
0x150d   :  { %4823 = vrsqrt.f32 %v1935_v43 }
0x1517   :  { %v4824_v48 = vpop.eup %4823 }
0x1518   :  { %v1939_v49 = vmul.f32 %v4824_v48, %v1923_v27  ;;  %v4271_v48 = vld [vmem:[%s5755_s2 + $0x1] ss:$0 sm:$0xff]  ;;  %s5033_s2 = smov [#allocation11]  }
0x1519   :  { %s4182_s27 = sshll.u32 %s5033_s2, 4  ;;  %s4183_s27 = int_to_ptr.vmem [resolvable:$true] %s4182_s27 }
0x151a   :  { %v1947_v52 = vmul.f32 %v4233_v50, %v1939_v49  ;;  %s4981_s8 = scalar_lea.vmem %s4183_s27, 256  ;;  %p4986_p13 = scmp.lt.s32.totalorder %s4183_s27, %s4183_s27 }
0x151b   :  { %p4982_p12 = scmp.ne.s32.totalorder %s4183_s27, %s4981_s8  ;;  %p4987_p0 = scmp.lt.s32.totalorder %s4981_s8, %s4981_s8 }
0x151c   :  { %v1955_v56 = vadd.f32 %v4234_v54, %v1947_v52 }
0x151d   :  { %p4988_p1 = por %p4987_p0, %p4986_p13 }
0x151f   :  { %p4989_p2 = pnand %p4988_p1, %p4982_p12 }
0x1599   :  { %v1932_v44 = vpop.xlane.xlu1 %1931 }
0x159a   :  { %v1934_v45 = vmul.f32 0.03125, %v1932_v44 }
0x159c   :  { %v1936_v46 = vadd.f32 1e-05, %v1934_v45 }
0x159e   :  { %4825 = vrsqrt.f32 %v1936_v46 }
0x15a8   :  { %v4826_v51 = vpop.eup %4825 }
0x15a9   :  { %v1940_v53 = vmul.f32 %v4826_v51, %v1924_v8 }
0x15ab   :  { %v1948_v55 = vmul.f32 %v4233_v50, %v1940_v53 }
0x15ad   :  { %v1956_v57 = vadd.f32 %v4234_v54, %v1948_v55 }
0x15af   :  { %v1957_v58 = vpack.c.bf16 %v1956_v57, %v1955_v56 }
0x15b1   :  { %4581 = vmatmul.mubr.msk.bf16.vlgmr.msra.gmra.mrb[32].mxu0 %vm163_vm1, %v1957_v58 }
0x15b2   :  { %4600 = vmatprep.mubr.msk.bf16.mxu0 %vm5021_vm0, %v5020_v0  ;;  %4597 = vmatpush3.bf16.msra.mxu0 %v4783_v47 }
0x15b3   :  { %4598 = vmatprep.subr.bf16.mxu0 %v5020_v0 }
0x15b6   :  { %4599 = vmatpush3.bf16.msra.mxu0 %v4784_v30 }
0x15b7   :  { %4604 = vmatprep.subr.mxu0 %v5020_v0 }
0x1684   :  { %v2013_v63 = vpop.f32.mrb[32].mxu0 }
0x1685   :  { %v2014_v1 = vadd.f32 %v4235_v62, %v2013_v63  ;;  %v4582_v41 = vpop.f32.mrb[33].mxu0 }
0x1686   :  { %v2016_v2 = vpop.f32.mrb[34].mxu0 }
0x1687   :  { %v2017_v34 = vadd.f32 %v4235_v62, %v2016_v2  ;;  %v4583_v5 = vpop.f32.mrb[35].mxu0  ;;  %v2020_v6 = vmax.f32 %v2014_v1, 0.0 }
0x1689   :  { %v2021_v7 = vmax.f32 %v2017_v34, 0.0 }
0x168b   :  { %v2022_v9 = vpack.c.bf16 %v2021_v7, %v2020_v6 }
0x168d   :  { %4593 = vmatmul.mubr.msk.bf16.vlgmr.msra.gmra.mrb[36].mxu1 %vm2053_vm4, %v2022_v9 }
0x168e   :  { %4611 = vmatprep.mubr.msk.f32.mxu1 %vm5021_vm0, %v5020_v0 }
0x1760   :  { %v2091_v11 = vpop.f32.mrb[36].mxu1 }
0x1761   :  { %v2092_v12 = vadd.f32 %v4239_v10, %v2091_v11  ;;  %v4594_v13 = vpop.f32.mrb[37].mxu1 }
0x1762   :  { %v2094_v14 = vpop.f32.mrb[38].mxu1 }
0x1763   :  { %v2095_v15 = vadd.f32 %v4239_v10, %v2094_v14  ;;  %v4595_v16 = vpop.f32.mrb[39].mxu1  ;;  %v2098_v17 = vadd.f32 %v2092_v12, %v1955_v56 }
0x1765   :  { %v2100_v18 = vsel %vm163_vm1, %v2098_v17, 0.0  ;;  %v2099_v3 = vadd.f32 %v2095_v15, %v1956_v57  ;;  %v4253_v15 = vld [vmem:[%s5756_s3 + $0x14] sm:$0xf] }
0x1766   :  { %2101 = vadd.xlane.f32.xlu0 %v2100_v18  ;;  %v5522_v16 = vsel %vm545_vm3, %v4253_v15, 0 }
0x1767   :  { %v2103_v61 = vsel %vm163_vm1, %v2099_v3, 0.0 }
0x1768   :  { %2104 = vadd.xlane.f32.xlu1 %v2103_v61 }
0x17f3   :  { %v2102_v19 = vpop.xlane.xlu0 %2101 }
0x17f4   :  { %v2106_v21 = vmul.f32 0.03125, %v2102_v19 }
0x17f5   :  { %v2105_v22 = vpop.xlane.xlu1 %2104 }
0x17f6   :  { %v2108_v23 = vsub.f32 %v2098_v17, %v2106_v21  ;;  %v2107_v24 = vmul.f32 0.03125, %v2105_v22 }
0x17f8   :  { %v2109_v25 = vsub.f32 %v2099_v3, %v2107_v24  ;;  %v2110_v26 = vmul.f32 %v2108_v23, %v2108_v23  ;;  %v4252_v24 = vld [vmem:[%s5756_s3 + $0x10] sm:$0xf] }
0x17fa   :  { %v2112_v27 = vsel %vm163_vm1, %v2110_v26, 0.0  ;;  %v2111_v28 = vmul.f32 %v2109_v25, %v2109_v25 }
0x17fb   :  { %2113 = vadd.xlane.f32.xlu1 %v2112_v27 }
0x17fc   :  { %v2115_v29 = vsel %vm163_vm1, %v2111_v28, 0.0 }
0x17ff   :  { %2116 = vadd.xlane.f32.xlu1 %v2115_v29 }
0x1888   :  { %v2114_v31 = vpop.xlane.xlu1 %2113 }
0x1889   :  { %v2118_v32 = vmul.f32 0.03125, %v2114_v31 }
0x188b   :  { %v2120_v33 = vadd.f32 1e-05, %v2118_v32 }
0x188c   :  { %v2117_v35 = vpop.xlane.xlu1 %2116 }
0x188d   :  { %4827 = vrsqrt.f32 %v2120_v33  ;;  %v2119_v8 = vmul.f32 0.03125, %v2117_v35 }
0x188f   :  { %v2121_v36 = vadd.f32 1e-05, %v2119_v8 }
0x1891   :  { %4829 = vrsqrt.f32 %v2121_v36 }
0x1897   :  { %v4828_v37 = vpop.eup %4827 }
0x1898   :  { %v2124_v38 = vmul.f32 %v4828_v37, %v2108_v23 }
0x189a   :  { %v2132_v40 = vmul.f32 %v4245_v4, %v2124_v38 }
0x189b   :  { %v4830_v39 = vpop.eup %4829 }
0x189c   :  { %v2125_v42 = vmul.f32 %v4830_v39, %v2109_v25  ;;  %v5473_v44 = vadd.f32 %v4246_v20, %v2132_v40  ;;  %v5538_v25 = vsel %vm545_vm3, %v4252_v24, 0 }
0x189e   :  { %v2133_v43 = vmul.f32 %v4245_v4, %v2125_v42 }
0x18a0   :  { %v5475_v45 = vadd.f32 %v4246_v20, %v2133_v43 }
0x18a2   :  { %v2182_v46 = vpack.c.bf16 %v5475_v45, %v5473_v44 }
0x18a4   :  { %4601 = vmatmul.mubr.msk.bf16.vlgmr.msra.gmra.mrb[36].mxu0 %vm163_vm1, %v2182_v46 }
0x18a5   :  { %4606 = vmatprep.mubr.msk.f32.mxu0 %vm5021_vm0, %v5020_v0 }
0x1977   :  { %v2238_v49 = vpop.f32.mrb[36].mxu0 }
0x1978   :  { %v5485_v50 = vadd.f32 %v4271_v48, %v2238_v49  ;;  %v4602_v51 = vpop.f32.mrb[37].mxu0 }
0x1979   :  { %v2241_v52 = vpop.f32.mrb[38].mxu0 }
0x197a   :  { %v5487_v53 = vadd.f32 %v4271_v48, %v2241_v52  ;;  %2411 = vrot.lane.b32.xlu0 %v5485_v50, %s5025_s30  ;;  %2246 = vrot.lane.b32.xlu1 %v5485_v50, %s5023_s0  ;;  %v4603_v54 = vpop.f32.mrb[39].mxu0 }
0x197e   :  { %2413 = vrot.lane.b32.xlu1 %v5485_v50, %s5024_s25 }
0x19ec   :  { %v2247_v55 = vpop.permute.xlu1 %2246  ;;  %v2412_v57 = vpop.permute.xlu0 %2411 }
0x19ed   :  { %4605 = vmatpush3.xpose.msk.msra.mxu0 %vm211_vm2, %v2247_v55 }
0x19ee   :  { %4614 = vmatprep.subr.mxu0 %v5020_v0 }
0x19f0   :  { %4607 = vmatmul.mubr.msk.f32.vlgmr.msra.gmra.mrb[40].mxu0 %vm211_vm2, %v5485_v50  ;;  %v2414_v56 = vpop.permute.xlu1 %2413 }
0x19f1   :  { %4615 = vmatpush3.xpose.msk.msra.mxu0 %vm211_vm2, %v2414_v56  ;;  %4616 = vmatprep.mubr.msk.f32.mxu0 %vm5021_vm0, %v5020_v0 }
0x19f2   :  { %4624 = vmatprep.subr.bf16.mxu0 %v5020_v0 }
0x19f4   :  { %4617 = vmatmul.mubr.msk.f32.vlgmr.msra.gmra.mrb[42].mxu0 %vm211_vm2, %v2412_v57 }
0x19f5   :  { %4626 = vmatprep.mubr.msk.bf16.mxu0 %vm5021_vm0, %v5020_v0  ;;  %4625 = vmatpush3.bf16.msra.mxu0 %v5522_v16 }
0x19f6   :  { %4636 = vmatprep.subr.mxu0 %v5020_v0 }
0x1ac3   :  { %v2318_v58 = vpop.f32.mrb[40].mxu0 }
0x1ac4   :  { %v2322_v59 = vmul.f32 0.35355338, %v2318_v58  ;;  %v4608_v60 = vpop.f32.mrb[41].mxu0 }
0x1ac6   :  { %v2323_v62 = vsel %vm211_vm2, %v2322_v59, -inf }
0x1ac7   :  { %2324 = vmax.xlane.f32.xlu1 %v2323_v62  ;;  %v2485_v63 = vpop.f32.mrb[42].mxu0  ;;  %v4254_v62 = vld [vmem:[%s5756_s3 + $0x18] sm:$0xf] }
0x1ac8   :  { %v2489_v1 = vmul.f32 0.35355338, %v2485_v63  ;;  %v4618_v41 = vpop.f32.mrb[43].mxu0  ;;  %v5576_v63 = vsel %vm545_vm3, %v4254_v62, 0 }
0x1aca   :  { %v2490_v2 = vsel %vm211_vm2, %v2489_v1, -inf }
0x1acb   :  { %2491 = vmax.xlane.f32.xlu0 %v2490_v2 }
0x1ae1   :  { %2501 = vrot.lane.b32.xlu0 %v5485_v50, %s5026_s14 }
0x1b54   :  { %v2325_v34 = vpop.xlane.xlu1 %2324 }
0x1b55   :  { %v2326_v5 = vsub.f32 %v2322_v59, %v2325_v34 }
0x1b57   :  { %v2327_v6 = vmul.f32 1.442695, %v2326_v5 }
0x1b58   :  { %v2492_v7 = vpop.xlane.xlu0 %2491 }
0x1b59   :  { %4831 = vpow2.f32 %v2327_v6  ;;  %v2493_v9 = vsub.f32 %v2489_v1, %v2492_v7 }
0x1b5b   :  { %v2494_v10 = vmul.f32 1.442695, %v2493_v9 }
0x1b5c   :  { %v2502_v21 = vpop.permute.xlu0 %2501 }
0x1b5d   :  { %4833 = vpow2.f32 %v2494_v10 }
0x1b63   :  { %v4832_v11 = vpop.eup %4831 }
0x1b64   :  { %v2329_v12 = vsel %vm211_vm2, %v4832_v11, 0.0 }
0x1b65   :  { %2330 = vadd.xlane.f32.xlu1 %v2329_v12 }
0x1b67   :  { %v4834_v13 = vpop.eup %4833 }
0x1b68   :  { %v2496_v14 = vsel %vm211_vm2, %v4834_v13, 0.0 }
0x1b69   :  { %2497 = vadd.xlane.f32.xlu1 %v2496_v14 }
0x1b7a   :  { %2334 = vrot.lane.b32.xlu1 %v5485_v50, %s5022_s29 }
0x1b7e   :  { %2672 = vrot.lane.b32.xlu1 %v5485_v50, %s5027_s15 }
0x1b82   :  { %2670 = vrot.lane.b32.xlu1 %v5485_v50, %s5028_s16 }
0x1bf2   :  { %v2331_v17 = vpop.xlane.xlu1 %2330 }
0x1bf3   :  { %4835 = vrcp.f32 %v2331_v17 }
0x1bf6   :  { %v2498_v18 = vpop.xlane.xlu1 %2497 }
0x1bf7   :  { %4837 = vrcp.f32 %v2498_v18 }
0x1bfa   :  { %v2335_v3 = vpop.permute.xlu1 %2334 }
0x1bfb   :  { %4610 = vmatpush3.msra.mxu1 %v2335_v3 }
0x1bfc   :  { %4619 = vmatprep.subr.mxu1 %v5020_v0 }
0x1bfd   :  { %v4836_v61 = vpop.eup %4835 }
0x1bfe   :  { %v2333_v19 = vmul.f32 %v4836_v61, %v4832_v11  ;;  %v2673_v31 = vpop.permute.xlu1 %2672 }
0x1c00   :  { %4612 = vmatmul.mubr.msk.f32.vlgmr.msra.gmra.mrb[40].mxu1 %vm211_vm2, %v2333_v19 }
0x1c01   :  { %v4838_v22 = vpop.eup %4837  ;;  %4620 = vmatpush3.msra.mxu1 %v2502_v21  ;;  %4621 = vmatprep.mubr.msk.f32.mxu1 %vm5021_vm0, %v5020_v0 }
0x1c02   :  { %v2500_v23 = vmul.f32 %v4838_v22, %v4834_v13  ;;  %4630 = vmatprep.subr.bf16.mxu1 %v5020_v0  ;;  %v2671_v32 = vpop.permute.xlu1 %2670 }
0x1c04   :  { %4622 = vmatmul.mubr.msk.f32.vlgmr.msra.gmra.mrb[42].mxu1 %vm211_vm2, %v2500_v23 }
0x1c05   :  { %4632 = vmatprep.mubr.msk.bf16.mxu1 %vm5021_vm0, %v5020_v0  ;;  %4631 = vmatpush3.bf16.msra.mxu1 %v5538_v25 }
0x1c06   :  { %4641 = vmatprep.subr.mxu1 %v5020_v0 }
0x1cd3   :  { %v2406_v26 = vpop.f32.mrb[40].mxu1 }
0x1cd4   :  { %v2410_v27 = vpack.c.bf16 %v2406_v26, %v2406_v26  ;;  %v4613_v28 = vpop.f32.mrb[41].mxu1 }
0x1cd6   :  { %4633 = vmatmul.mubr.msk.bf16.vlgmr.msra.gmra.mrb[44].mxu1 %vm211_vm2, %v2410_v27 }
0x1cd7   :  { %v2573_v29 = vpop.f32.mrb[42].mxu1  ;;  %4643 = vmatprep.mubr.msk.f32.mxu1 %vm5021_vm0, %v5020_v0 }
0x1cd8   :  { %v2577_v47 = vpack.c.bf16 %v2573_v29, %v2573_v29  ;;  %v4623_v30 = vpop.f32.mrb[43].mxu1 }
0x1cda   :  { %4627 = vmatmul.mubr.msk.bf16.vlgmr.msra.gmra.mrb[44].mxu0 %vm211_vm2, %v2577_v47 }
0x1cdb   :  { %4637 = vmatpush3.xpose.msk.msra.mxu0 %vm211_vm2, %v2673_v31  ;;  %4638 = vmatprep.mubr.msk.f32.mxu0 %vm5021_vm0, %v5020_v0 }
0x1cdc   :  { %4646 = vmatprep.subr.bf16.mxu0 %v5020_v0 }
0x1ce2   :  { %4639 = vmatmul.mubr.msk.f32.vlgmr.msra.gmra.mrb[48].mxu0 %vm211_vm2, %v2671_v32 }
0x1ce3   :  { %4648 = vmatprep.mubr.msk.bf16.mxu0 %vm5021_vm0, %v5020_v0  ;;  %4647 = vmatpush3.bf16.msra.mxu0 %v5576_v63 }
0x1ce4   :  { %4662 = vmatprep.subr.bf16.mxu0 %v5020_v0 }
0x1da9   :  { %v2664_v33 = vpop.f32.mrb[44].mxu1 }
0x1daa   :  { %v4634_v35 = vpop.f32.mrb[45].mxu1 }
0x1dab   :  { %v2667_v8 = vpop.f32.mrb[46].mxu1 }
0x1dac   :  { %v4635_v36 = vpop.f32.mrb[47].mxu1 }
0x1dad   :  { %v2618_v37 = vpop.f32.mrb[44].mxu0 }
0x1dae   :  { %v5553_v38 = vadd.f32 %v2664_v33, %v2618_v37  ;;  %v4628_v4 = vpop.f32.mrb[45].mxu0 }
0x1daf   :  { %v2621_v39 = vpop.f32.mrb[46].mxu0 }
0x1db0   :  { %v4629_v40 = vpop.f32.mrb[47].mxu0 }
0x1db5   :  { %v2744_v42 = vpop.f32.mrb[48].mxu0 }
0x1db6   :  { %v2748_v20 = vmul.f32 0.35355338, %v2744_v42  ;;  %v4640_v43 = vpop.f32.mrb[49].mxu0 }
0x1db8   :  { %v2749_v46 = vsel %vm211_vm2, %v2748_v20, -inf }
0x1db9   :  { %2750 = vmax.xlane.f32.xlu1 %v2749_v46 }
0x1dca   :  { %2886 = vrot.lane.b32.xlu1 %v5485_v50, %s5030_s5 }
0x1dce   :  { %2884 = vrot.lane.b32.xlu1 %v5485_v50, %s5031_s4 }
0x1e46   :  { %v2751_v48 = vpop.xlane.xlu1 %2750 }
0x1e47   :  { %v2752_v49 = vsub.f32 %v2748_v20, %v2751_v48 }
0x1e49   :  { %v2753_v51 = vmul.f32 1.442695, %v2752_v49 }
0x1e4a   :  { %v2887_v58 = vpop.permute.xlu1 %2886 }
0x1e4b   :  { %4839 = vpow2.f32 %v2753_v51 }
0x1e4e   :  { %v2885_v60 = vpop.permute.xlu1 %2884 }
0x1e55   :  { %v4840_v52 = vpop.eup %4839 }
0x1e56   :  { %v2755_v54 = vsel %vm211_vm2, %v4840_v52, 0.0 }
0x1e57   :  { %2756 = vadd.xlane.f32.xlu0 %v2755_v54 }
0x1e6d   :  { %2760 = vrot.lane.b32.xlu0 %v5485_v50, %s5029_s24 }
0x1ee4   :  { %v2757_v55 = vpop.xlane.xlu0 %2756 }
0x1ee5   :  { %4841 = vrcp.f32 %v2757_v55 }
0x1ee8   :  { %v2761_v56 = vpop.permute.xlu0 %2760 }
0x1ee9   :  { %4642 = vmatpush3.msra.mxu1 %v2761_v56 }
0x1eea   :  { %4652 = vmatprep.subr.mxu1 %v5020_v0 }
0x1eef   :  { %v4842_v57 = vpop.eup %4841 }
0x1ef0   :  { %v2759_v59 = vmul.f32 %v4842_v57, %v4840_v52 }
0x1ef2   :  { %4644 = vmatmul.mubr.msk.f32.vlgmr.msra.gmra.mrb[48].mxu1 %vm211_vm2, %v2759_v59 }
0x1ef3   :  { %4653 = vmatpush3.xpose.msk.msra.mxu1 %vm211_vm2, %v2887_v58  ;;  %4654 = vmatprep.mubr.msk.f32.mxu1 %vm5021_vm0, %v5020_v0 }
0x1ef4   :  { %4657 = vmatprep.subr.mxu1 %v5020_v0 }
0x1ef6   :  { %4655 = vmatmul.mubr.msk.f32.vlgmr.msra.gmra.mrb[50].mxu1 %vm211_vm2, %v2885_v60 }
0x1ef7   :  { %4659 = vmatprep.mubr.msk.f32.mxu1 %vm5021_vm0, %v5020_v0 }
0x1fc5   :  { %v2832_v1 = vpop.f32.mrb[48].mxu1 }
0x1fc6   :  { %v2836_v41 = vpack.c.bf16 %v2832_v1, %v2832_v1  ;;  %v4645_v2 = vpop.f32.mrb[49].mxu1 }
0x1fc8   :  { %4649 = vmatmul.mubr.msk.bf16.vlgmr.msra.gmra.mrb[52].mxu0 %vm211_vm2, %v2836_v41 }
0x1fc9   :  { %v2958_v34 = vpop.f32.mrb[50].mxu1  ;;  %4664 = vmatprep.mubr.msk.bf16.mxu0 %vm5021_vm0, %v5020_v0 }
0x1fca   :  { %v2962_v5 = vmul.f32 0.35355338, %v2958_v34  ;;  %v4656_v6 = vpop.f32.mrb[51].mxu1 }
0x1fcc   :  { %v2963_v7 = vsel %vm211_vm2, %v2962_v5, -inf }
0x1fcd   :  { %2964 = vmax.xlane.f32.xlu0 %v2963_v7 }
0x1fe3   :  { %2974 = vrot.lane.b32.xlu0 %v5485_v50, %s5032_s18  ;;  %v4255_v50 = vld [vmem:[%s5756_s3 + $0x1c] sm:$0xf] }
0x1fe4   :  { %v5598_v15 = vsel %vm545_vm3, %v4255_v50, 0 }
0x1fe5   :  { %4663 = vmatpush3.bf16.msra.mxu0 %v5598_v15 }
0x1fe6   :  { %4678 = vmatprep.subr.mxu0 %v5020_v0 }
0x1fe7   :  { %3266 = vrot.lane.b32.xlu0 %v5487_v53, %s5024_s25 }
0x205a   :  { %v2965_v9 = vpop.xlane.xlu0 %2964 }
0x205b   :  { %v2966_v10 = vsub.f32 %v2962_v5, %v2965_v9 }
0x205d   :  { %v2967_v11 = vmul.f32 1.442695, %v2966_v10 }
0x205e   :  { %v2975_v12 = vpop.permute.xlu0 %2974 }
0x205f   :  { %4843 = vpow2.f32 %v2967_v11  ;;  %4658 = vmatpush3.msra.mxu1 %v2975_v12 }
0x2060   :  { %4668 = vmatprep.subr.mxu1 %v5020_v0 }
0x2062   :  { %v3267_v29 = vpop.permute.xlu0 %3266 }
0x2069   :  { %v4844_v13 = vpop.eup %4843 }
0x206a   :  { %v2969_v14 = vsel %vm211_vm2, %v4844_v13, 0.0 }
0x206b   :  { %2970 = vadd.xlane.f32.xlu1 %v2969_v14 }
0x207c   :  { %3099 = vrot.lane.b32.xlu1 %v5487_v53, %s5023_s0 }
0x2080   :  { %3264 = vrot.lane.b32.xlu1 %v5487_v53, %s5025_s30 }
0x209b   :  { %v2877_v17 = vpop.f32.mrb[52].mxu0 }
0x209c   :  { %v2883_v18 = vadd.f32 %v2877_v17, %v5553_v38  ;;  %v4650_v3 = vpop.f32.mrb[53].mxu0 }
0x209d   :  { %v2880_v61 = vpop.f32.mrb[54].mxu0 }
0x209e   :  { %v4651_v19 = vpop.f32.mrb[55].mxu0 }
0x20f8   :  { %v2971_v21 = vpop.xlane.xlu1 %2970 }
0x20f9   :  { %4845 = vrcp.f32 %v2971_v21 }
0x20fc   :  { %v3100_v24 = vpop.permute.xlu1 %3099 }
0x2100   :  { %v3265_v33 = vpop.permute.xlu1 %3264 }
0x2103   :  { %v4846_v22 = vpop.eup %4845 }
0x2104   :  { %v2973_v23 = vmul.f32 %v4846_v22, %v4844_v13 }
0x2106   :  { %4660 = vmatmul.mubr.msk.f32.vlgmr.msra.gmra.mrb[52].mxu1 %vm211_vm2, %v2973_v23 }
0x2107   :  { %4669 = vmatpush3.xpose.msk.msra.mxu1 %vm211_vm2, %v3100_v24  ;;  %4670 = vmatprep.mubr.msk.f32.mxu1 %vm5021_vm0, %v5020_v0 }
0x2108   :  { %4673 = vmatprep.subr.mxu1 %v5020_v0 }
0x210a   :  { %4671 = vmatmul.mubr.msk.f32.vlgmr.msra.gmra.mrb[54].mxu1 %vm211_vm2, %v5487_v53 }
0x210b   :  { %4675 = vmatprep.mubr.msk.f32.mxu1 %vm5021_vm0, %v5020_v0 }
0x21d9   :  { %v3046_v26 = vpop.f32.mrb[52].mxu1 }
0x21da   :  { %v3050_v27 = vpack.c.bf16 %v3046_v26, %v3046_v26  ;;  %v4661_v28 = vpop.f32.mrb[53].mxu1 }
0x21dc   :  { %4665 = vmatmul.mubr.msk.bf16.vlgmr.msra.gmra.mrb[56].mxu0 %vm211_vm2, %v3050_v27 }
0x21dd   :  { %4679 = vmatpush3.xpose.msk.msra.mxu0 %vm211_vm2, %v3267_v29  ;;  %v3171_v47 = vpop.f32.mrb[54].mxu1  ;;  %4680 = vmatprep.mubr.msk.f32.mxu0 %vm5021_vm0, %v5020_v0 }
0x21de   :  { %v3175_v30 = vmul.f32 0.35355338, %v3171_v47  ;;  %v4672_v31 = vpop.f32.mrb[55].mxu1  ;;  %4688 = vmatprep.subr.bf16.mxu0 %v5020_v0 }
0x21e0   :  { %v3176_v32 = vsel %vm211_vm2, %v3175_v30, -inf }
0x21e1   :  { %3177 = vmax.xlane.f32.xlu0 %v3176_v32 }
0x21e4   :  { %4681 = vmatmul.mubr.msk.f32.vlgmr.msra.gmra.mrb[50].mxu0 %vm211_vm2, %v3265_v33 }
0x21e5   :  { %4689 = vmatpush3.bf16.msra.mxu0 %v5522_v16  ;;  %4690 = vmatprep.mubr.msk.bf16.mxu0 %vm5021_vm0, %v5020_v0 }
0x21e6   :  { %4700 = vmatprep.subr.mxu0 %v5020_v0 }
0x226e   :  { %v3178_v35 = vpop.xlane.xlu0 %3177 }
0x226f   :  { %v3179_v8 = vsub.f32 %v3175_v30, %v3178_v35  ;;  %v4307_v35 = vld [vmem:[#allocation5 + $0x1] ss:$0 sm:$0xff] }
0x2271   :  { %v3180_v36 = vmul.f32 1.442695, %v3179_v8 }
0x2273   :  { %4847 = vpow2.f32 %v3180_v36 }
0x227d   :  { %v4848_v37 = vpop.eup %4847 }
0x227e   :  { %v3182_v38 = vsel %vm211_vm2, %v4848_v37, 0.0 }
0x227f   :  { %3183 = vadd.xlane.f32.xlu0 %v3182_v38 }
0x22af   :  { %v3091_v4 = vpop.f32.mrb[56].mxu0 }
0x22b0   :  { %v5624_v39 = vadd.f32 %v3091_v4, %v2883_v18  ;;  %v4666_v40 = vpop.f32.mrb[57].mxu0 }
0x22b1   :  { %v3094_v42 = vpop.f32.mrb[58].mxu0 }
0x22b2   :  { %v4667_v20 = vpop.f32.mrb[59].mxu0  ;;  %v3945_v38 = vadd.f32 %v4307_v35, %v5624_v39 }
0x22b7   :  { %v3338_v16 = vpop.f32.mrb[50].mxu0 }
0x22b8   :  { %v3342_v43 = vmul.f32 0.35355338, %v3338_v16  ;;  %v4682_v46 = vpop.f32.mrb[51].mxu0  ;;  %v3947_v16 = vadd.f32 %v3945_v38, %v5473_v44  ;;  %v4789_v38 = vld [vmem:[%s5762_s9 + $0x30] sm:$0xff]  }
0x22ba   :  { %v3343_v48 = vsel %vm211_vm2, %v3342_v43, -inf }
0x22bb   :  { %3344 = vmax.xlane.f32.xlu1 %v3343_v48 }
0x22cc   :  { %3187 = vrot.lane.b32.xlu1 %v5487_v53, %s5022_s29 }
0x22d0   :  { %3519 = vrot.lane.b32.xlu1 %v5487_v53, %s5027_s15 }
0x22d4   :  { %3517 = vrot.lane.b32.xlu1 %v5487_v53, %s5028_s16 }
0x230c   :  { %v3184_v49 = vpop.xlane.xlu0 %3183 }
0x230d   :  { %4849 = vrcp.f32 %v3184_v49 }
0x2317   :  { %v4850_v52 = vpop.eup %4849 }
0x2318   :  { %v3186_v56 = vmul.f32 %v4850_v52, %v4848_v37 }
0x2348   :  { %v3345_v51 = vpop.xlane.xlu1 %3344 }
0x2349   :  { %v3346_v54 = vsub.f32 %v3342_v43, %v3345_v51  ;;  %v3949_v43 = vsel %vm163_vm1, %v3947_v16, 0.0 }
0x234b   :  { %v3347_v55 = vmul.f32 1.442695, %v3346_v54 }
0x234c   :  { %v3188_v57 = vpop.permute.xlu1 %3187 }
0x234d   :  { %4851 = vpow2.f32 %v3347_v55  ;;  %4674 = vmatpush3.msra.mxu1 %v3188_v57 }
0x234e   :  { %4676 = vmatmul.mubr.msk.f32.vlgmr.msra.gmra.mrb[56].mxu1 %vm211_vm2, %v3186_v56  ;;  %4683 = vmatprep.subr.mxu1 %v5020_v0 }
0x234f   :  { %4685 = vmatprep.mubr.msk.f32.mxu1 %vm5021_vm0, %v5020_v0 }
0x2350   :  { %v3520_v10 = vpop.permute.xlu1 %3519 }
0x2357   :  { %v4852_v58 = vpop.eup %4851 }
0x2358   :  { %v3349_v59 = vsel %vm211_vm2, %v4852_v58, 0.0 }
0x2359   :  { %3350 = vadd.xlane.f32.xlu0 %v3349_v59 }
0x236f   :  { %3354 = vrot.lane.b32.xlu0 %v5487_v53, %s5026_s14 }
0x23e6   :  { %v3351_v60 = vpop.xlane.xlu0 %3350 }
0x23e7   :  { %4853 = vrcp.f32 %v3351_v60 }
0x23ea   :  { %v3355_v62 = vpop.permute.xlu0 %3354 }
0x23eb   :  { %4684 = vmatpush3.msra.mxu1 %v3355_v62 }
0x23ec   :  { %4694 = vmatprep.subr.bf16.mxu1 %v5020_v0 }
0x23f1   :  { %v4854_v1 = vpop.eup %4853 }
0x23f2   :  { %v3353_v41 = vmul.f32 %v4854_v1, %v4852_v58 }
0x23f4   :  { %4686 = vmatmul.mubr.msk.f32.vlgmr.msra.gmra.mrb[58].mxu1 %vm211_vm2, %v3353_v41 }
0x23f5   :  { %4695 = vmatpush3.bf16.msra.mxu1 %v5538_v25  ;;  %4696 = vmatprep.mubr.msk.bf16.mxu1 %vm5021_vm0, %v5020_v0  ;;  %v3518_v25 = vpop.permute.xlu1 %3517 }
0x23f6   :  { %4705 = vmatprep.subr.mxu1 %v5020_v0 }
0x2421   :  { %v3259_v2 = vpop.f32.mrb[56].mxu1 }
0x2422   :  { %v3263_v34 = vpack.c.bf16 %v3259_v2, %v3259_v2  ;;  %v4677_v5 = vpop.f32.mrb[57].mxu1 }
0x2424   :  { %4697 = vmatmul.mubr.msk.bf16.vlgmr.msra.gmra.mrb[60].mxu1 %vm211_vm2, %v3263_v34 }
0x2425   :  { %4707 = vmatprep.mubr.msk.f32.mxu1 %vm5021_vm0, %v5020_v0 }
0x24c7   :  { %v3426_v6 = vpop.f32.mrb[58].mxu1 }
0x24c8   :  { %v3430_v7 = vpack.c.bf16 %v3426_v6, %v3426_v6  ;;  %v4687_v9 = vpop.f32.mrb[59].mxu1 }
0x24ca   :  { %4691 = vmatmul.mubr.msk.bf16.vlgmr.msra.gmra.mrb[60].mxu0 %vm211_vm2, %v3430_v7 }
0x24cb   :  { %4701 = vmatpush3.xpose.msk.msra.mxu0 %vm211_vm2, %v3520_v10  ;;  %4702 = vmatprep.mubr.msk.f32.mxu0 %vm5021_vm0, %v5020_v0 }
0x24cc   :  { %4710 = vmatprep.subr.bf16.mxu0 %v5020_v0 }
0x24d2   :  { %4703 = vmatmul.mubr.msk.f32.vlgmr.msra.gmra.mrb[64].mxu0 %vm211_vm2, %v3518_v25 }
0x24d3   :  { %4711 = vmatpush3.bf16.msra.mxu0 %v5576_v63  ;;  %4712 = vmatprep.mubr.msk.bf16.mxu0 %vm5021_vm0, %v5020_v0 }
0x24d4   :  { %4740 = vmatprep.subr.bf16.mxu0 %v5020_v0 }
0x24f7   :  { %v3511_v11 = vpop.f32.mrb[60].mxu1 }
0x24f8   :  { %v4698_v12 = vpop.f32.mrb[61].mxu1 }
0x24f9   :  { %v3514_v13 = vpop.f32.mrb[62].mxu1 }
0x24fa   :  { %v4699_v14 = vpop.f32.mrb[63].mxu1 }
0x259d   :  { %v3468_v50 = vpop.f32.mrb[60].mxu0 }
0x259e   :  { %v3512_v17 = vadd.f32 %v3511_v11, %v3468_v50  ;;  %v4692_v18 = vpop.f32.mrb[61].mxu0 }
0x259f   :  { %v3471_v3 = vpop.f32.mrb[62].mxu0 }
0x25a0   :  { %v4693_v61 = vpop.f32.mrb[63].mxu0 }
0x25a1   :  { %v4785_v61 = vld [vmem:[%s5760_s7 + $0x10] sm:$0xff]  }
0x25a5   :  { %v3591_v19 = vpop.f32.mrb[64].mxu0 }
0x25a6   :  { %v3595_v21 = vmul.f32 0.35355338, %v3591_v19  ;;  %v4704_v22 = vpop.f32.mrb[65].mxu0  ;;  %v4787_v19 = vld [vmem:[%s5762_s9 + $0x20] sm:$0xff]  }
0x25a8   :  { %v3596_v23 = vsel %vm211_vm2, %v3595_v21, -inf }
0x25a9   :  { %3597 = vmax.xlane.f32.xlu0 %v3596_v23 }
0x25bf   :  { %3607 = vrot.lane.b32.xlu0 %v5487_v53, %s5029_s24 }
0x25c3   :  { %3728 = vrot.lane.b32.xlu0 %v5487_v53, %s5031_s4 }
0x2636   :  { %v3598_v63 = vpop.xlane.xlu0 %3597 }
0x2637   :  { %v3599_v24 = vsub.f32 %v3595_v21, %v3598_v63  ;;  %v4788_v21 = vld [vmem:[%s5762_s9 + $0x28] sm:$0xff]  }
0x2639   :  { %v3600_v26 = vmul.f32 1.442695, %v3599_v24 }
0x263a   :  { %v3608_v27 = vpop.permute.xlu0 %3607 }
0x263b   :  { %4855 = vpow2.f32 %v3600_v26  ;;  %4706 = vmatpush3.msra.mxu1 %v3608_v27 }
0x263c   :  { %4716 = vmatprep.subr.mxu1 %v5020_v0 }
0x263e   :  { %v3729_v33 = vpop.permute.xlu0 %3728 }
0x2645   :  { %v4856_v28 = vpop.eup %4855 }
0x2646   :  { %v3602_v29 = vsel %vm211_vm2, %v4856_v28, 0.0 }
0x2647   :  { %3603 = vadd.xlane.f32.xlu1 %v3602_v29 }
0x2658   :  { %3730 = vrot.lane.b32.xlu1 %v5487_v53, %s5030_s5 }
0x26d4   :  { %v3604_v47 = vpop.xlane.xlu1 %3603 }
0x26d5   :  { %4857 = vrcp.f32 %v3604_v47  ;;  %v4308_v47 = vld [vmem:[#allocation7 + $0x1] ss:$0 sm:$0xff] }
0x26d8   :  { %v3731_v32 = vpop.permute.xlu1 %3730 }
0x26df   :  { %v4858_v30 = vpop.eup %4857 }
0x26e0   :  { %v3606_v31 = vmul.f32 %v4858_v30, %v4856_v28 }
0x26e2   :  { %4708 = vmatmul.mubr.msk.f32.vlgmr.msra.gmra.mrb[64].mxu1 %vm211_vm2, %v3606_v31 }
0x26e3   :  { %4717 = vmatpush3.xpose.msk.msra.mxu1 %vm211_vm2, %v3731_v32  ;;  %4718 = vmatprep.mubr.msk.f32.mxu1 %vm5021_vm0, %v5020_v0 }
0x26e4   :  { %4721 = vmatprep.subr.mxu1 %v5020_v0 }
0x26e6   :  { %4719 = vmatmul.mubr.msk.f32.vlgmr.msra.gmra.mrb[66].mxu1 %vm211_vm2, %v3729_v33  ;;  %v4309_v33 = vld [vmem:[#allocation8 + $0x1] ss:$0 sm:$0xff] }
0x26e7   :  { %4723 = vmatprep.mubr.msk.f32.mxu1 %vm5021_vm0, %v5020_v0 }
0x27b5   :  { %v3679_v8 = vpop.f32.mrb[64].mxu1 }
0x27b6   :  { %v3683_v36 = vpack.c.bf16 %v3679_v8, %v3679_v8  ;;  %v4709_v37 = vpop.f32.mrb[65].mxu1 }
0x27b8   :  { %4713 = vmatmul.mubr.msk.bf16.vlgmr.msra.gmra.mrb[68].mxu0 %vm211_vm2, %v3683_v36 }
0x27b9   :  { %v3802_v4 = vpop.f32.mrb[66].mxu1  ;;  %4748 = vmatprep.mubr.msk.bf16.mxu0 %vm5021_vm0, %v5020_v0  ;;  %4741 = vmatpush3.bf16.msra.mxu0 %v4787_v19 }
0x27ba   :  { %v3806_v40 = vmul.f32 0.35355338, %v3802_v4  ;;  %v4720_v42 = vpop.f32.mrb[67].mxu1  ;;  %4742 = vmatprep.subr.bf16.mxu0 %v5020_v0  ;;  %v4790_v4 = vld [vmem:[%s5762_s9 + $0x38] sm:$0xff]  }
0x27bc   :  { %v3807_v20 = vsel %vm211_vm2, %v3806_v40, -inf }
0x27bd   :  { %3808 = vmax.xlane.f32.xlu1 %v3807_v20  ;;  %4743 = vmatpush3.bf16.msra.mxu0 %v4788_v21 }
0x27be   :  { %4744 = vmatprep.subr.bf16.mxu0 %v5020_v0 }
0x27c1   :  { %3950 = vadd.xlane.f32.xlu1 %v3949_v43  ;;  %4745 = vmatpush3.bf16.msra.mxu0 %v4789_v38 }
0x27c2   :  { %4746 = vmatprep.subr.bf16.mxu0 %v5020_v0 }
0x27c5   :  { %4747 = vmatpush3.bf16.msra.mxu0 %v4790_v4 }
0x284a   :  { %v3809_v46 = vpop.xlane.xlu1 %3808 }
0x284b   :  { %v3810_v48 = vsub.f32 %v3806_v40, %v3809_v46  ;;  %v4310_v40 = vld [vmem:[#allocation10 + $0x1] ss:$0 sm:$0xff] }
0x284d   :  { %v3811_v49 = vmul.f32 1.442695, %v3810_v48 }
0x284e   :  { %v3951_v41 = vpop.xlane.xlu1 %3950 }
0x284f   :  { %4859 = vpow2.f32 %v3811_v49  ;;  %v3955_v2 = vmul.f32 0.03125, %v3951_v41 }
0x2859   :  { %v4860_v39 = vpop.eup %4859 }
0x285a   :  { %v3813_v51 = vsel %vm211_vm2, %v4860_v39, 0.0 }
0x285b   :  { %3814 = vadd.xlane.f32.xlu0 %v3813_v51 }
0x2871   :  { %3818 = vrot.lane.b32.xlu0 %v5487_v53, %s5032_s18 }
0x288b   :  { %v3721_v52 = vpop.f32.mrb[68].mxu0 }
0x288c   :  { %v3727_v54 = vadd.f32 %v3721_v52, %v3512_v17  ;;  %v4714_v55 = vpop.f32.mrb[69].mxu0 }
0x288d   :  { %v3724_v56 = vpop.f32.mrb[70].mxu0 }
0x288e   :  { %v4715_v44 = vpop.f32.mrb[71].mxu0 }
0x28e8   :  { %v3815_v57 = vpop.xlane.xlu0 %3814 }
0x28e9   :  { %4861 = vrcp.f32 %v3815_v57 }
0x28ec   :  { %v3819_v58 = vpop.permute.xlu0 %3818 }
0x28ed   :  { %4722 = vmatpush3.msra.mxu1 %v3819_v58 }
0x28ee   :  { %4726 = vmatprep.subr.bf16.mxu1 %v5020_v0 }
0x28f3   :  { %v4862_v59 = vpop.eup %4861 }
0x28f4   :  { %v3817_v60 = vmul.f32 %v4862_v59, %v4860_v39 }
0x28f6   :  { %4724 = vmatmul.mubr.msk.f32.vlgmr.msra.gmra.mrb[68].mxu1 %vm211_vm2, %v3817_v60 }
0x28f7   :  { %4727 = vmatpush3.bf16.msra.mxu1 %v5598_v15  ;;  %4728 = vmatprep.mubr.msk.bf16.mxu1 %vm5021_vm0, %v5020_v0  ;;  %v3957_v15 = vsub.f32 %v3947_v16, %v3955_v2 }
0x28f8   :  { %4732 = vmatprep.subr.bf16.mxu1 %v5020_v0 }
0x28f9   :  { %v3959_v12 = vmul.f32 %v3957_v15, %v3957_v15 }
0x28fb   :  { %v3961_v13 = vsel %vm163_vm1, %v3959_v12, 0.0 }
0x29c9   :  { %v3890_v53 = vpop.f32.mrb[68].mxu1 }
0x29ca   :  { %v3894_v62 = vpack.c.bf16 %v3890_v53, %v3890_v53  ;;  %v4725_v1 = vpop.f32.mrb[69].mxu1 }
0x29cc   :  { %4729 = vmatmul.mubr.msk.bf16.vlgmr.msra.gmra.mrb[72].mxu1 %vm211_vm2, %v3894_v62 }
0x29cd   :  { %4736 = vmatprep.mubr.msk.bf16.mxu1 %vm5021_vm0, %v5020_v0  ;;  %4733 = vmatpush3.bf16.msra.mxu1 %v4785_v61 }
0x29ce   :  { %4734 = vmatprep.subr.bf16.mxu1 %v5020_v0  ;;  %v4314_v0 = vld [vmem:[%s5763_s10 + $0x1] ss:$0 sm:$0xff] }
0x2a9f   :  { %v3932_v34 = vpop.f32.mrb[72].mxu1 }
0x2aa0   :  { %v3938_v5 = vadd.f32 %v3932_v34, %v3727_v54  ;;  %v4730_v6 = vpop.f32.mrb[73].mxu1 }
0x2aa1   :  { %v3935_v7 = vpop.f32.mrb[74].mxu1 }
0x2aa2   :  { %v3946_v9 = vadd.f32 %v4307_v35, %v3938_v5  ;;  %v4731_v10 = vpop.f32.mrb[75].mxu1 }
0x2aa4   :  { %v3948_v25 = vadd.f32 %v3946_v9, %v5475_v45  ;;  %v4786_v45 = vld [vmem:[%s5760_s7 + $0x18] sm:$0xff]  }
0x2aa5   :  { %4735 = vmatpush3.bf16.msra.mxu1 %v4786_v45 }
0x2aa6   :  { %v3952_v11 = vsel %vm163_vm1, %v3948_v25, 0.0 }
0x2aa7   :  { %3953 = vadd.xlane.f32.xlu1 %v3952_v11 }
0x2aab   :  { %3962 = vadd.xlane.f32.xlu1 %v3961_v13 }
0x2b34   :  { %v3954_v14 = vpop.xlane.xlu1 %3953 }
0x2b35   :  { %v3956_v50 = vmul.f32 0.03125, %v3954_v14 }
0x2b37   :  { %v3958_v17 = vsub.f32 %v3948_v25, %v3956_v50 }
0x2b38   :  { %v3963_v22 = vpop.xlane.xlu1 %3962 }
0x2b39   :  { %v3960_v18 = vmul.f32 %v3958_v17, %v3958_v17  ;;  %v3967_v23 = vmul.f32 0.03125, %v3963_v22 }
0x2b3b   :  { %v3964_v3 = vsel %vm163_vm1, %v3960_v18, 0.0  ;;  %v3969_v63 = vadd.f32 1e-05, %v3967_v23 }
0x2b3c   :  { %3965 = vadd.xlane.f32.xlu1 %v3964_v3  ;;  %v4321_v3 = vld [vmem:[%s5765_s12 + $0x1] ss:$0 sm:$0xff] }
0x2b3d   :  { %4863 = vrsqrt.f32 %v3969_v63 }
0x2b47   :  { %v4864_v28 = vpop.eup %4863 }
0x2b48   :  { %v3973_v29 = vmul.f32 %v4864_v28, %v3957_v15 }
0x2b4a   :  { %v3981_v31 = vmul.f32 %v4308_v47, %v3973_v29 }
0x2b4c   :  { %v3989_v8 = vadd.f32 %v4309_v33, %v3981_v31 }
0x2bc9   :  { %v3966_v24 = vpop.xlane.xlu1 %3965 }
0x2bca   :  { %v3968_v26 = vmul.f32 0.03125, %v3966_v24 }
0x2bcc   :  { %v3970_v27 = vadd.f32 1e-05, %v3968_v26 }
0x2bce   :  { %4865 = vrsqrt.f32 %v3970_v27 }
0x2bd8   :  { %v4866_v30 = vpop.eup %4865 }
0x2bd9   :  { %v3974_v32 = vmul.f32 %v4866_v30, %v3958_v17  ;;  %v4320_v17 = vld [vmem:[%s5764_s11 + $0x1] ss:$0 sm:$0xff] }
0x2bdb   :  { %v3982_v35 = vmul.f32 %v4308_v47, %v3974_v32 }
0x2bdd   :  { %v3990_v36 = vadd.f32 %v4309_v33, %v3982_v35 }
0x2bdf   :  { %v3991_v37 = vpack.c.bf16 %v3990_v36, %v3989_v8 }
0x2be1   :  { %4737 = vmatmul.mubr.msk.bf16.vlgmr.msra.gmra.mrb[76].mxu1 %vm163_vm1, %v3991_v37 }
0x2cb4   :  { %v4047_v42 = vpop.f32.mrb[76].mxu1 }
0x2cb5   :  { %v4048_v20 = vadd.f32 %v4310_v40, %v4047_v42  ;;  %v4738_v16 = vpop.f32.mrb[77].mxu1 }
0x2cb6   :  { %v4050_v43 = vpop.f32.mrb[78].mxu1 }
0x2cb7   :  { %v4051_v46 = vadd.f32 %v4310_v40, %v4050_v43  ;;  %v4739_v48 = vpop.f32.mrb[79].mxu1  ;;  %v4054_v49 = vmax.f32 %v4048_v20, 0.0 }
0x2cb9   :  { %v4055_v39 = vmax.f32 %v4051_v46, 0.0 }
0x2cbb   :  { %v4056_v51 = vpack.c.bf16 %v4055_v39, %v4054_v49 }
0x2cbd   :  { %4749 = vmatmul.mubr.msk.bf16.vlgmr.msra.gmra.mrb[72].mxu0 %vm2053_vm4, %v4056_v51 }
0x2d90   :  { %v4124_v52 = vpop.f32.mrb[72].mxu0 }
0x2d91   :  { %v4125_v54 = vadd.f32 %v4314_v0, %v4124_v52  ;;  %v4750_v55 = vpop.f32.mrb[73].mxu0 }
0x2d92   :  { %v4127_v56 = vpop.f32.mrb[74].mxu0 }
0x2d93   :  { %v4131_v44 = vadd.f32 %v4125_v54, %v3989_v8  ;;  %v4128_v57 = vadd.f32 %v4314_v0, %v4127_v56  ;;  %v4751_v58 = vpop.f32.mrb[75].mxu0 }
0x2d95   :  { %v4132_v59 = vadd.f32 %v4128_v57, %v3990_v36  ;;  %v4133_v60 = vsel %vm163_vm1, %v4131_v44, 0.0 }
0x2d96   :  { %4134 = vadd.xlane.f32.xlu1 %v4133_v60 }
0x2d97   :  { %v4136_v53 = vsel %vm163_vm1, %v4132_v59, 0.0 }
0x2d9a   :  { %4137 = vadd.xlane.f32.xlu1 %v4136_v53 }
0x2e23   :  { %v4135_v62 = vpop.xlane.xlu1 %4134 }
0x2e24   :  { %v4139_v1 = vmul.f32 0.03125, %v4135_v62 }
0x2e26   :  { %v4141_v41 = vsub.f32 %v4131_v44, %v4139_v1 }
0x2e27   :  { %v4138_v2 = vpop.xlane.xlu1 %4137 }
0x2e28   :  { %v4140_v34 = vmul.f32 0.03125, %v4138_v2  ;;  %v4143_v5 = vmul.f32 %v4141_v41, %v4141_v41 }
0x2e2a   :  { %v4142_v6 = vsub.f32 %v4132_v59, %v4140_v34  ;;  %v4145_v7 = vsel %vm163_vm1, %v4143_v5, 0.0 }
0x2e2b   :  { %4146 = vadd.xlane.f32.xlu0 %v4145_v7 }
0x2e2c   :  { %v4144_v15 = vmul.f32 %v4142_v6, %v4142_v6 }
0x2e2e   :  { %v4148_v9 = vsel %vm163_vm1, %v4144_v15, 0.0 }
0x2e2f   :  { %4149 = vadd.xlane.f32.xlu1 %v4148_v9 }
0x2eb8   :  { %v4147_v10 = vpop.xlane.xlu0 %4146 }
0x2eb9   :  { %v4151_v25 = vmul.f32 0.03125, %v4147_v10 }
0x2ebb   :  { %v4153_v11 = vadd.f32 1e-05, %v4151_v25 }
0x2ebc   :  { %v4150_v12 = vpop.xlane.xlu1 %4149 }
0x2ebd   :  { %4867 = vrsqrt.f32 %v4153_v11  ;;  %v4152_v13 = vmul.f32 0.03125, %v4150_v12 }
0x2ebf   :  { %v4154_v14 = vadd.f32 1e-05, %v4152_v13 }
0x2ec1   :  { %4869 = vrsqrt.f32 %v4154_v14 }
0x2ec7   :  { %v4868_v50 = vpop.eup %4867 }
0x2ec8   :  { %v4157_v18 = vmul.f32 %v4868_v50, %v4141_v41 }
0x2eca   :  { %v4165_v61 = vmul.f32 %v4320_v17, %v4157_v18 }
0x2ecb   :  { %v4870_v45 = vpop.eup %4869 }
0x2ecc   :  { %v4158_v19 = vmul.f32 %v4870_v45, %v4142_v6  ;;  %v4173_v21 = vadd.f32 %v4321_v3, %v4165_v61 }
0x2ece   :  { %v4166_v22 = vmul.f32 %v4320_v17, %v4158_v19  ;;  %4175 = vst.msk [vmem:[#allocation11] sm:$0xff] %vm163_vm1, %v4173_v21 }
0x2ed0   :  { %v4174_v23 = vadd.f32 %v4321_v3, %v4166_v22 }
0x2ed2   :  { %4176 = vst.msk [vmem:[#allocation11 + $0x8] sm:$0xff] %vm163_vm1, %v4174_v23 }
0x2ed3   :  { %4992 = shalt.err (!%p4989_p2)
}
0x2ed4   :  { %s4993_s19 = scalar_lea.hbm %s5766_s13, 256 }
0x2ed5   :  { %p4994_p3 = scmp.ne.s32.totalorder %s5766_s13, %s4993_s19  ;;  %p4997_p4 = scmp.lt.u32.totalorder %s4993_s19, %s5766_s13 }
0x2ed7   :  { %p4999_p5 = pnand %p4997_p4, %p4994_p3 }
0x2ed9   :  { %5002 = shalt.err (!%p4999_p5)
}
0x2eda   :  { %4188 = dma.vmem_to_hbm [thread:$0]  %s4183_s27, 256, %s5766_s13, [#allocation4], %s5016_s6, %s5016_s6, %s5017_s23  }
0x2edb   :  { %5009 = dma.done.wait [#allocation4], 256  }
0x2edc   :  { %5010 = vsyncadd [#allocation4], 4294967040 }
0x2edd   :  { %4192 = vsyncpa [#allocation3], 1 }
0x2ede   :  { %4193 = vsyncpa [#allocation6], 1 }
0x2edf   :  { %4194 = vsyncpa [#allocation9], 1 }
0x2ee0   :  { %4195 = vsyncpa [#allocation4], 1 }

</bundles_post_ra>
